<compile_context>
chip_gen: v6e
topology: v6e:2x2x1
jax: 0.10.0
libtpu: 0.0.40
codegen_flags: <defaults>
</compile_context>

<pallas_src>
import math

import jax
import jax.numpy as jnp
from jax.experimental import pallas as pl
from jax.experimental.pallas import tpu as pltpu

# ----------------------------- small, module-consistent config ------------------------
EMB_SIZE = 14                                     # address embedding dim (small config)
TIME_FEATURES = 1
HIDDEN = (TIME_FEATURES + EMB_SIZE + 1) * 2       # = 32 (exact formula from __init__)
NUM_HEADS = 4                                     # must divide HIDDEN (12 in original)
HEAD_DIM = HIDDEN // NUM_HEADS                    # 8
NUM_LAYERS = 2                                    # small BertConfig (12 in HF default)
INTERMEDIATE = 64                                 # small BertConfig (3072 in HF default)
KNOWN_ADDRESS_LEN = 50
OUT_DIM = EMB_SIZE * 2                            # use_compositor=False -> emb_size*2
OUT_PAD = 128                                     # lane-dense padded head width
LN_EPS = 1e-12                                    # HF BertConfig.layer_norm_eps
ATTN_SCALE = 1.0 / math.sqrt(HEAD_DIM)
MAX_B_TILE = 128                                  # up to 128*16 = 2048 rows per MXU push


def _round_up(x, m):
    return ((x + m - 1) // m) * m


# ----------------------------------- kernel helpers -----------------------------------
def _layernorm(x, g, b):
    mu = jnp.mean(x, axis=-1, keepdims=True)
    var = jnp.mean((x - mu) ** 2, axis=-1, keepdims=True)
    return (x - mu) * jax.lax.rsqrt(var + LN_EPS) * g + b


def _gelu(x):
    # TODO(synk): HF 'gelu' is the exact erf-based GELU; erf has no reliable Mosaic
    # lowering, so the tanh approximation is used (agrees to ~1e-3).
    return 0.5 * x * (1.0 + jnp.tanh(0.7978845608028654 * (x + 0.044715 * x * x * x)))


# -------------------------------------- the kernel -------------------------------------
def _make_kernel(seq_len, seq_pad):
    """seq_len: real sequence length (9); seq_pad: sublane-tile padded length (16)."""

    def kernel(feats_ref, pos_ref, eg_ref, eb_ref,
               wqkv_ref, bqkv_ref, wo_ref, bo_ref, g1_ref, b1_ref,
               wi_ref, bi_ref, wo2_ref, bo2_ref, g2_ref, b2_ref,
               lw_ref, lb_ref, out_ref):
        R, H = feats_ref.shape                       # R = bt*seq_pad rows, H = 32
        BT = R // seq_pad

        # Constant masks (computed once, outside the layer loop).
        lane = jax.lax.broadcasted_iota(jnp.int32, (1, H), 1)
        head_masks = [((lane >= h * HEAD_DIM) & (lane < (h + 1) * HEAD_DIM))
                      .astype(jnp.float32) for h in range(NUM_HEADS)]      # (1, H) each
        kpos = jax.lax.broadcasted_iota(jnp.int32, (1, seq_pad), 1)
        kbias = jnp.where(kpos < seq_len, 0.0, -1e30).astype(jnp.float32)  # (1, seq_pad)

        # BertEmbeddings: inputs_embeds + position + token_type(0), then LayerNorm.
        x = feats_ref[...].reshape(BT, seq_pad, H) + pos_ref[...]          # tile-aligned
        x2 = _layernorm(x.reshape(R, H), eg_ref[...], eb_ref[...])         # (R, H) f32

        for l in range(NUM_LAYERS):
            # --- self attention -------------------------------------------------------
            # One fused QKV matmul over all rows (attn scale pre-folded into Q weights).
            qkv = jnp.dot(x2.astype(jnp.bfloat16), wqkv_ref[l],
                          preferred_element_type=jnp.float32) + bqkv_ref[l]   # (R, 3H)
            qkv3 = qkv.reshape(BT, seq_pad, 3 * H)                             # free
            q3 = qkv3[..., 0 * H:1 * H]
            k3 = qkv3[..., 1 * H:2 * H]
            v3 = qkv3[..., 2 * H:3 * H]

            # Stack head-masked queries along the tile-aligned row axis:
            # (BT, NUM_HEADS*seq_pad, H).  Sublane-aligned concat (not a lane concat).
            q_stack = jnp.concatenate(
                [q3 * head_masks[h] for h in range(NUM_HEADS)], axis=1)

            # One score matmul + one context matmul per batch element for ALL heads.
            s = jnp.einsum('bqd,bkd->bqk', q_stack, k3,
                           preferred_element_type=jnp.float32) + kbias
            s = s - jnp.max(s, axis=-1, keepdims=True)
            p = jnp.exp(s)
            p = p * pl.reciprocal(jnp.sum(p, axis=-1, keepdims=True), approx=True)
            ctx_stack = jnp.einsum('bqk,bkd->bqd', p, v3,
                                   preferred_element_type=jnp.float32)  # (BT, NH*sp, H)

            # Merge heads: sublane-aligned slices + masked adds (no lane concat).
            ctx = sum(ctx_stack[:, h * seq_pad:(h + 1) * seq_pad, :] * head_masks[h]
                      for h in range(NUM_HEADS))                         # (BT, sp, H)
            ctx2 = ctx.reshape(R, H)                                     # tile-aligned

            attn = jnp.dot(ctx2.astype(jnp.bfloat16), wo_ref[l],
                           preferred_element_type=jnp.float32) + bo_ref[l]
            x2 = _layernorm(attn + x2, g1_ref[l], b1_ref[l])

            # --- feed forward ----------------------------------------------------------
            inter = _gelu(jnp.dot(x2.astype(jnp.bfloat16), wi_ref[l],
                                  preferred_element_type=jnp.float32) + bi_ref[l])
            ff = jnp.dot(inter.astype(jnp.bfloat16), wo2_ref[l],
                         preferred_element_type=jnp.float32) + bo2_ref[l]
            x2 = _layernorm(ff + x2, g2_ref[l], b2_ref[l])

        # Final regression head, padded to 128 lanes for unmasked output stores.
        y = jnp.dot(x2.astype(jnp.bfloat16), lw_ref[...],
                    preferred_element_type=jnp.float32) + lb_ref[...]
        out_ref[...] = y                                                  # (R, OUT_PAD)

    return kernel


# ----------------------------------- pallas wrapper ------------------------------------
def _bert_pallas(features, packed):
    B, S, H = features.shape
    s_pad = _round_up(S, 8)
    assert H == HIDDEN and packed["pos_tok"].shape[0] == s_pad

    # Batch tiling: amortize per-grid-step overhead, but keep >=2 steps so both v7x
    # TensorCores get work (no-op on single-TC v5e/v6e).
    n_steps = (B + MAX_B_TILE - 1) // MAX_B_TILE
    if B >= 2:
        n_steps = max(n_steps, 2)
    bt = (B + n_steps - 1) // n_steps
    b_pad = n_steps * bt

    feats = jnp.pad(features, ((0, b_pad - B), (0, s_pad - S), (0, 0)))
    feats2 = feats.reshape(b_pad * s_pad, H)                  # sublane-dense 2D layout

    weight_inputs = (packed["pos_tok"], packed["emb_ln_g"], packed["emb_ln_b"],
                     packed["wqkv"], packed["bqkv"], packed["wo"], packed["bo"],
                     packed["ln1_g"], packed["ln1_b"], packed["wi"], packed["bi"],
                     packed["wo2"], packed["bo2"], packed["ln2_g"], packed["ln2_b"],
                     packed["lw"], packed["lb"])

    def full_spec(a):                                         # resident, never re-DMA'd
        return pl.BlockSpec(a.shape, lambda i, _n=a.ndim: (0,) * _n)

    in_specs = ([pl.BlockSpec((bt * s_pad, H), lambda i: (i, 0))]
                + [full_spec(a) for a in weight_inputs])
    out_spec = pl.BlockSpec((bt * s_pad, OUT_PAD), lambda i: (i, 0))

    out = pl.pallas_call(
        _make_kernel(S, s_pad),
        grid=(n_steps,),
        in_specs=in_specs,
        out_specs=out_spec,
        out_shape=jax.ShapeDtypeStruct((b_pad * s_pad, OUT_PAD), jnp.float32),
        compiler_params=pltpu.CompilerParams(dimension_semantics=("parallel",)),
    )(feats2, *weight_inputs)

    out = out.reshape(b_pad, s_pad, OUT_PAD)
    return out[:B, :S, :OUT_DIM]


# ------------------------------------ forward wrapper ----------------------------------
def forward(packed, numeric_features, from_address, to_address, time_features,
            msk_ind, volumes):
    # numeric_features is accepted but unused (matches the PyTorch forward).
    del numeric_features

    from_emb = packed["address_embedding"][from_address]           # (B, S0, EMB)
    to_emb = packed["address_embedding"][to_address]                # (B, S0, EMB)

    # get_time_features_emb
    feat = time_features @ packed["feature_matrix"]                 # (B, S0, TF)
    time_emb = jnp.concatenate([jnp.cos(feat), jnp.sin(feat)], axis=-1)

    features = jnp.concatenate(
        [from_emb, to_emb, time_emb, volumes, jnp.ones_like(volumes)], axis=-1)
    B, S0, H = features.shape
    assert H == HIDDEN

    cls_data = jnp.tile(packed["cls_token"][None, None, :], (B, 1, 1))
    features = jnp.concatenate([cls_data, features], axis=1)        # (B, S0+1, H)
    # PyTorch masks AFTER prepending CLS, so msk_ind indexes the post-CLS sequence.
    features = features.at[:, msk_ind, -1].set(0.0)
    features = features.at[:, msk_ind, -2].set(0.0)

    out = _bert_pallas(features, packed)                             # (B, S0+1, OUT_DIM)

    return dict(cls_result=out[:, 0, :],
                result=out[:, 1:, :],
                from_emb=from_emb,
                to_emb=to_emb)


# ---------------------------------- parameter handling ---------------------------------
def init_params(key):
    ks = jax.random.split(key, 24)

    def nrm(k, shape, scale=0.02):
        return (scale * jax.random.normal(k, shape)).astype(jnp.float32)

    L, H, I = NUM_LAYERS, HIDDEN, INTERMEDIATE
    return dict(
        address_embedding=nrm(ks[0], (KNOWN_ADDRESS_LEN + 1, EMB_SIZE), 1.0),
        cls_token=nrm(ks[1], (H,), 1.0),
        feature_matrix=nrm(ks[2], (1, TIME_FEATURES), 1.0),
        # BertEmbeddings
        pos_emb=nrm(ks[3], (64, H)),
        tok_emb=nrm(ks[4], (1, H)),
        emb_ln_g=jnp.ones((1, H), jnp.float32),
        emb_ln_b=jnp.zeros((1, H), jnp.float32),
        # Encoder layers (stacked along a leading layer axis)
        wq=nrm(ks[5], (L, H, H)), bq=nrm(ks[6], (L, 1, H)),
        wk=nrm(ks[7], (L, H, H)), bk=nrm(ks[8], (L, 1, H)),
        wv=nrm(ks[9], (L, H, H)), bv=nrm(ks[10], (L, 1, H)),
        wo=nrm(ks[11], (L, H, H)), bo=nrm(ks[12], (L, 1, H)),
        ln1_g=jnp.ones((L, 1, H), jnp.float32), ln1_b=jnp.zeros((L, 1, H), jnp.float32),
        wi=nrm(ks[13], (L, H, I)), bi=nrm(ks[14], (L, 1, I)),
        wo2=nrm(ks[15], (L, I, H)), bo2=nrm(ks[16], (L, 1, H)),
        ln2_g=jnp.ones((L, 1, H), jnp.float32), ln2_b=jnp.zeros((L, 1, H), jnp.float32),
        # final Linear(hidden -> emb_size*2)
        lin_w=nrm(ks[17], (H, OUT_DIM)), lin_b=nrm(ks[18], (1, OUT_DIM)),
    )


def pack_params(params, seq_len):
    """One-time weight packing (hoisted out of the per-call path)."""
    s_pad = _round_up(seq_len, 8)
    bf16 = jnp.bfloat16
    # Fold the 1/sqrt(head_dim) attention scale into the Q projection.
    wq = params["wq"] * ATTN_SCALE
    bq = params["bq"] * ATTN_SCALE
    wqkv = jnp.concatenate([wq, params["wk"], params["wv"]], axis=-1).astype(bf16)
    bqkv = jnp.concatenate([bq, params["bk"], params["bv"]], axis=-1)    # f32
    lw = jnp.pad(params["lin_w"], ((0, 0), (0, OUT_PAD - OUT_DIM))).astype(bf16)
    lb = jnp.pad(params["lin_b"], ((0, 0), (0, OUT_PAD - OUT_DIM)))
    pos_tok = params["pos_emb"][:s_pad] + params["tok_emb"]              # (s_pad, H)

    return dict(
        # plain-JAX front-end params
        address_embedding=params["address_embedding"],
        cls_token=params["cls_token"],
        feature_matrix=params["feature_matrix"],
        # kernel params
        pos_tok=pos_tok,
        emb_ln_g=params["emb_ln_g"], emb_ln_b=params["emb_ln_b"],
        wqkv=wqkv, bqkv=bqkv,
        wo=params["wo"].astype(bf16), bo=params["bo"],
        ln1_g=params["ln1_g"], ln1_b=params["ln1_b"],
        wi=params["wi"].astype(bf16), bi=params["bi"],
        wo2=params["wo2"].astype(bf16), bo2=params["bo2"],
        ln2_g=params["ln2_g"], ln2_b=params["ln2_b"],
        lw=lw, lb=lb,
    )


# ----------------------------------------- main -----------------------------------------
if __name__ == "__main__":
    key = jax.random.PRNGKey(0)
    kp, k1, k2, k3, k4, k5 = jax.random.split(key, 6)
    params = init_params(kp)

    B, S0 = 2, 8
    packed = pack_params(params, seq_len=S0 + 1)

    numeric_features = jax.random.normal(k1, (B, S0, 3), jnp.float32)   # unused in forward
    from_address = jax.random.randint(k2, (B, S0), 0, KNOWN_ADDRESS_LEN + 1, jnp.int32)
    to_address = jax.random.randint(k3, (B, S0), 0, KNOWN_ADDRESS_LEN + 1, jnp.int32)
    time_feats = jax.random.normal(k4, (B, S0, 1), jnp.float32)
    volumes = jax.random.normal(k5, (B, S0, 1), jnp.float32)
    msk_ind = 3

    out = forward(packed, numeric_features, from_address, to_address,
                  time_feats, msk_ind, volumes)
    out = jax.block_until_ready(out)

    assert out["cls_result"].shape == (B, OUT_DIM)
    assert out["result"].shape == (B, S0, OUT_DIM)
    assert out["from_emb"].shape == (B, S0, EMB_SIZE)
    assert out["to_emb"].shape == (B, S0, EMB_SIZE)
    assert bool(jnp.all(jnp.isfinite(out["result"])))
    assert bool(jnp.all(jnp.isfinite(out["cls_result"])))
    print("KERNEL_OK")
</pallas_src>

<mosaic_0001>
module attributes {stable_mosaic.version = 11 : i64} {
  func.func @kernel(%arg0: i32, %arg1: memref<16x32xf32, #tpu.memory_space<vmem>>, %arg2: memref<16x32xf32, #tpu.memory_space<vmem>>, %arg3: memref<1x32xf32, #tpu.memory_space<vmem>>, %arg4: memref<1x32xf32, #tpu.memory_space<vmem>>, %arg5: memref<2x32x96xbf16, #tpu.memory_space<vmem>>, %arg6: memref<2x1x96xf32, #tpu.memory_space<vmem>>, %arg7: memref<2x32x32xbf16, #tpu.memory_space<vmem>>, %arg8: memref<2x1x32xf32, #tpu.memory_space<vmem>>, %arg9: memref<2x1x32xf32, #tpu.memory_space<vmem>>, %arg10: memref<2x1x32xf32, #tpu.memory_space<vmem>>, %arg11: memref<2x32x64xbf16, #tpu.memory_space<vmem>>, %arg12: memref<2x1x64xf32, #tpu.memory_space<vmem>>, %arg13: memref<2x64x32xbf16, #tpu.memory_space<vmem>>, %arg14: memref<2x1x32xf32, #tpu.memory_space<vmem>>, %arg15: memref<2x1x32xf32, #tpu.memory_space<vmem>>, %arg16: memref<2x1x32xf32, #tpu.memory_space<vmem>>, %arg17: memref<32x128xbf16, #tpu.memory_space<vmem>>, %arg18: memref<1x128xf32, #tpu.memory_space<vmem>>, %arg19: memref<16x128xf32, #tpu.memory_space<vmem>>) attributes {dimension_semantics = [#tpu.dimension_semantics<parallel>], iteration_bounds = array<i64: 2>, scalar_prefetch = 0 : i64, scratch_operands = 0 : i64, tpu.core_type = #tpu.core_type<tc>, window_params = [{transform_indices = @transform_0, window_bounds = array<i64: 16, 32>}, {pipeline_mode = #tpu.pipeline_mode<synchronous>, transform_indices = @transform_1, window_bounds = array<i64: 16, 32>}, {pipeline_mode = #tpu.pipeline_mode<synchronous>, transform_indices = @transform_2, window_bounds = array<i64: 1, 32>}, {pipeline_mode = #tpu.pipeline_mode<synchronous>, transform_indices = @transform_3, window_bounds = array<i64: 1, 32>}, {pipeline_mode = #tpu.pipeline_mode<synchronous>, transform_indices = @transform_4, window_bounds = array<i64: 2, 32, 96>}, {pipeline_mode = #tpu.pipeline_mode<synchronous>, transform_indices = @transform_5, window_bounds = array<i64: 2, 1, 96>}, {pipeline_mode = #tpu.pipeline_mode<synchronous>, transform_indices = @transform_6, window_bounds = array<i64: 2, 32, 32>}, {pipeline_mode = #tpu.pipeline_mode<synchronous>, transform_indices = @transform_7, window_bounds = array<i64: 2, 1, 32>}, {pipeline_mode = #tpu.pipeline_mode<synchronous>, transform_indices = @transform_8, window_bounds = array<i64: 2, 1, 32>}, {pipeline_mode = #tpu.pipeline_mode<synchronous>, transform_indices = @transform_9, window_bounds = array<i64: 2, 1, 32>}, {pipeline_mode = #tpu.pipeline_mode<synchronous>, transform_indices = @transform_10, window_bounds = array<i64: 2, 32, 64>}, {pipeline_mode = #tpu.pipeline_mode<synchronous>, transform_indices = @transform_11, window_bounds = array<i64: 2, 1, 64>}, {pipeline_mode = #tpu.pipeline_mode<synchronous>, transform_indices = @transform_12, window_bounds = array<i64: 2, 64, 32>}, {pipeline_mode = #tpu.pipeline_mode<synchronous>, transform_indices = @transform_13, window_bounds = array<i64: 2, 1, 32>}, {pipeline_mode = #tpu.pipeline_mode<synchronous>, transform_indices = @transform_14, window_bounds = array<i64: 2, 1, 32>}, {pipeline_mode = #tpu.pipeline_mode<synchronous>, transform_indices = @transform_15, window_bounds = array<i64: 2, 1, 32>}, {pipeline_mode = #tpu.pipeline_mode<synchronous>, transform_indices = @transform_16, window_bounds = array<i64: 32, 128>}, {pipeline_mode = #tpu.pipeline_mode<synchronous>, transform_indices = @transform_17, window_bounds = array<i64: 1, 128>}, {transform_indices = @transform_18, window_bounds = array<i64: 16, 128>}]} {
    %0 = tpu.iota {dimensions = array<i32: 1>} : vector<1x32xi32>
    %c0_i32 = arith.constant 0 : i32
    %1 = vector.broadcast %c0_i32 : i32 to vector<1x32xi32>
    %2 = arith.cmpi sge, %0, %1 : vector<1x32xi32>
    %c8_i32 = arith.constant 8 : i32
    %3 = vector.broadcast %c8_i32 : i32 to vector<1x32xi32>
    %4 = arith.cmpi slt, %0, %3 : vector<1x32xi32>
    %5 = arith.andi %2, %4 : vector<1x32xi1>
    %6 = arith.extui %5 : vector<1x32xi1> to vector<1x32xi32>
    %7 = arith.sitofp %6 : vector<1x32xi32> to vector<1x32xf32>
    %c8_i32_0 = arith.constant 8 : i32
    %8 = vector.broadcast %c8_i32_0 : i32 to vector<1x32xi32>
    %9 = arith.cmpi sge, %0, %8 : vector<1x32xi32>
    %c16_i32 = arith.constant 16 : i32
    %10 = vector.broadcast %c16_i32 : i32 to vector<1x32xi32>
    %11 = arith.cmpi slt, %0, %10 : vector<1x32xi32>
    %12 = arith.andi %9, %11 : vector<1x32xi1>
    %13 = arith.extui %12 : vector<1x32xi1> to vector<1x32xi32>
    %14 = arith.sitofp %13 : vector<1x32xi32> to vector<1x32xf32>
    %c16_i32_1 = arith.constant 16 : i32
    %15 = vector.broadcast %c16_i32_1 : i32 to vector<1x32xi32>
    %16 = arith.cmpi sge, %0, %15 : vector<1x32xi32>
    %c24_i32 = arith.constant 24 : i32
    %17 = vector.broadcast %c24_i32 : i32 to vector<1x32xi32>
    %18 = arith.cmpi slt, %0, %17 : vector<1x32xi32>
    %19 = arith.andi %16, %18 : vector<1x32xi1>
    %20 = arith.extui %19 : vector<1x32xi1> to vector<1x32xi32>
    %21 = arith.sitofp %20 : vector<1x32xi32> to vector<1x32xf32>
    %c24_i32_2 = arith.constant 24 : i32
    %22 = vector.broadcast %c24_i32_2 : i32 to vector<1x32xi32>
    %23 = arith.cmpi sge, %0, %22 : vector<1x32xi32>
    %c32_i32 = arith.constant 32 : i32
    %24 = vector.broadcast %c32_i32 : i32 to vector<1x32xi32>
    %25 = arith.cmpi slt, %0, %24 : vector<1x32xi32>
    %26 = arith.andi %23, %25 : vector<1x32xi1>
    %27 = arith.extui %26 : vector<1x32xi1> to vector<1x32xi32>
    %28 = arith.sitofp %27 : vector<1x32xi32> to vector<1x32xf32>
    %29 = tpu.iota {dimensions = array<i32: 1>} : vector<1x16xi32>
    %c9_i32 = arith.constant 9 : i32
    %30 = vector.broadcast %c9_i32 : i32 to vector<1x16xi32>
    %31 = arith.cmpi slt, %29, %30 : vector<1x16xi32>
    %cst = arith.constant 0.000000e+00 : f32
    %cst_3 = arith.constant -1.000000e+30 : f32
    %32 = vector.broadcast %cst : f32 to vector<1x16xf32>
    %33 = vector.broadcast %cst_3 : f32 to vector<1x16xf32>
    %34 = arith.select %31, %32, %33 : vector<1x16xi1>, vector<1x16xf32>
    %c0 = arith.constant 0 : index
    %c0_4 = arith.constant 0 : index
    %35 = vector.load %arg1[%c0, %c0_4] : memref<16x32xf32, #tpu.memory_space<vmem>>, vector<16x32xf32>
    %36 = vector.shape_cast %35 : vector<16x32xf32> to vector<1x16x32xf32>
    %c0_5 = arith.constant 0 : index
    %c0_6 = arith.constant 0 : index
    %37 = vector.load %arg2[%c0_5, %c0_6] : memref<16x32xf32, #tpu.memory_space<vmem>>, vector<16x32xf32>
    %38 = vector.shape_cast %37 : vector<16x32xf32> to vector<1x16x32xf32>
    %39 = arith.addf %36, %38 : vector<1x16x32xf32>
    %40 = vector.shape_cast %39 : vector<1x16x32xf32> to vector<16x32xf32>
    %c0_7 = arith.constant 0 : index
    %c0_8 = arith.constant 0 : index
    %41 = vector.load %arg3[%c0_7, %c0_8] : memref<1x32xf32, #tpu.memory_space<vmem>>, vector<1x32xf32>
    %c0_9 = arith.constant 0 : index
    %c0_10 = arith.constant 0 : index
    %42 = vector.load %arg4[%c0_9, %c0_10] : memref<1x32xf32, #tpu.memory_space<vmem>>, vector<1x32xf32>
    %cst_11 = arith.constant dense<0.000000e+00> : vector<16xf32>
    %43 = vector.multi_reduction <add>, %40, %cst_11 [1] : vector<16x32xf32> to vector<16xf32>
    %44 = vector.shape_cast %43 : vector<16xf32> to vector<16x1xf32>
    %cst_12 = arith.constant 3.200000e+01 : f32
    %45 = vector.broadcast %cst_12 : f32 to vector<16x1xf32>
    %46 = arith.divf %44, %45 : vector<16x1xf32>
    %47 = vector.broadcast %46 : vector<16x1xf32> to vector<16x32xf32>
    %48 = arith.subf %40, %47 : vector<16x32xf32>
    %49 = arith.mulf %48, %48 : vector<16x32xf32>
    %cst_13 = arith.constant dense<0.000000e+00> : vector<16xf32>
    %50 = vector.multi_reduction <add>, %49, %cst_13 [1] : vector<16x32xf32> to vector<16xf32>
    %51 = vector.shape_cast %50 : vector<16xf32> to vector<16x1xf32>
    %cst_14 = arith.constant 3.200000e+01 : f32
    %52 = vector.broadcast %cst_14 : f32 to vector<16x1xf32>
    %53 = arith.divf %51, %52 : vector<16x1xf32>
    %54 = vector.broadcast %46 : vector<16x1xf32> to vector<16x32xf32>
    %55 = arith.subf %40, %54 : vector<16x32xf32>
    %cst_15 = arith.constant 9.99999996E-13 : f32
    %56 = vector.broadcast %cst_15 : f32 to vector<16x1xf32>
    %57 = arith.addf %53, %56 : vector<16x1xf32>
    %58 = math.rsqrt %57 : vector<16x1xf32>
    %59 = vector.broadcast %58 : vector<16x1xf32> to vector<16x32xf32>
    %60 = arith.mulf %55, %59 : vector<16x32xf32>
    %61 = vector.broadcast %41 : vector<1x32xf32> to vector<16x32xf32>
    %62 = arith.mulf %60, %61 : vector<16x32xf32>
    %63 = vector.broadcast %42 : vector<1x32xf32> to vector<16x32xf32>
    %64 = arith.addf %62, %63 : vector<16x32xf32>
    %65 = arith.truncf %64 : vector<16x32xf32> to vector<16x32xbf16>
    %c0_16 = arith.constant 0 : index
    %c0_17 = arith.constant 0 : index
    %c0_18 = arith.constant 0 : index
    %66 = vector.load %arg5[%c0_16, %c0_17, %c0_18] : memref<2x32x96xbf16, #tpu.memory_space<vmem>>, vector<1x32x96xbf16>
    %67 = vector.shape_cast %66 : vector<1x32x96xbf16> to vector<32x96xbf16>
    %cst_19 = arith.constant dense<0.000000e+00> : vector<16x96xf32>
    %68 = tpu.matmul %65, %67, %cst_19 {dimension_numbers = #tpu.dot_dimension_numbers<[1], [0], [0], [1], [0, 0, 1, 1], [], []>} : vector<16x32xbf16>, vector<32x96xbf16>, vector<16x96xf32> -> vector<16x96xf32>
    %c0_20 = arith.constant 0 : index
    %c0_21 = arith.constant 0 : index
    %c0_22 = arith.constant 0 : index
    %69 = vector.load %arg6[%c0_20, %c0_21, %c0_22] : memref<2x1x96xf32, #tpu.memory_space<vmem>>, vector<1x1x96xf32>
    %70 = vector.shape_cast %69 : vector<1x1x96xf32> to vector<1x96xf32>
    %71 = vector.broadcast %70 : vector<1x96xf32> to vector<16x96xf32>
    %72 = arith.addf %68, %71 : vector<16x96xf32>
    %73 = vector.shape_cast %72 : vector<16x96xf32> to vector<1x16x96xf32>
    %74 = vector.extract_strided_slice %73 {offsets = [0, 0, 0], sizes = [1, 16, 32], strides = [1, 1, 1]} : vector<1x16x96xf32> to vector<1x16x32xf32>
    %75 = vector.extract_strided_slice %73 {offsets = [0, 0, 32], sizes = [1, 16, 32], strides = [1, 1, 1]} : vector<1x16x96xf32> to vector<1x16x32xf32>
    %76 = vector.extract_strided_slice %73 {offsets = [0, 0, 64], sizes = [1, 16, 32], strides = [1, 1, 1]} : vector<1x16x96xf32> to vector<1x16x32xf32>
    %77 = vector.shape_cast %7 : vector<1x32xf32> to vector<1x1x32xf32>
    %78 = vector.broadcast %77 : vector<1x1x32xf32> to vector<1x16x32xf32>
    %79 = arith.mulf %74, %78 : vector<1x16x32xf32>
    %80 = vector.shape_cast %14 : vector<1x32xf32> to vector<1x1x32xf32>
    %81 = vector.broadcast %80 : vector<1x1x32xf32> to vector<1x16x32xf32>
    %82 = arith.mulf %74, %81 : vector<1x16x32xf32>
    %83 = vector.shape_cast %21 : vector<1x32xf32> to vector<1x1x32xf32>
    %84 = vector.broadcast %83 : vector<1x1x32xf32> to vector<1x16x32xf32>
    %85 = arith.mulf %74, %84 : vector<1x16x32xf32>
    %86 = vector.shape_cast %28 : vector<1x32xf32> to vector<1x1x32xf32>
    %87 = vector.broadcast %86 : vector<1x1x32xf32> to vector<1x16x32xf32>
    %88 = arith.mulf %74, %87 : vector<1x16x32xf32>
    %89 = tpu.concatenate %79, %82, %85, %88 in 1 : vector<1x16x32xf32>, vector<1x16x32xf32>, vector<1x16x32xf32>, vector<1x16x32xf32> -> vector<1x64x32xf32>
    "tpu.trace_start"() <{level = 10 : i32, message = "bqd,bkd->bqk"}> : () -> ()
    %cst_23 = arith.constant dense<0.000000e+00> : vector<1x64x16xf32>
    %90 = tpu.matmul %89, %75, %cst_23 {dimension_numbers = #tpu.dot_dimension_numbers<[2], [2], [1], [1], [0, 0, 0, 1, 1, 1], [0], [0]>} : vector<1x64x32xf32>, vector<1x16x32xf32>, vector<1x64x16xf32> -> vector<1x64x16xf32>
    "tpu.trace_stop"() : () -> ()
    %91 = vector.shape_cast %34 : vector<1x16xf32> to vector<1x1x16xf32>
    %92 = vector.broadcast %91 : vector<1x1x16xf32> to vector<1x64x16xf32>
    %93 = arith.addf %90, %92 : vector<1x64x16xf32>
    %cst_24 = arith.constant dense<0xFF800000> : vector<1x64xf32>
    %94 = vector.multi_reduction <maximumf>, %93, %cst_24 [2] : vector<1x64x16xf32> to vector<1x64xf32>
    %95 = vector.shape_cast %94 : vector<1x64xf32> to vector<1x64x1xf32>
    %96 = vector.broadcast %95 : vector<1x64x1xf32> to vector<1x64x16xf32>
    %97 = arith.subf %93, %96 : vector<1x64x16xf32>
    %98 = math.exp %97 : vector<1x64x16xf32>
    %cst_25 = arith.constant dense<0.000000e+00> : vector<1x64xf32>
    %99 = vector.multi_reduction <add>, %98, %cst_25 [2] : vector<1x64x16xf32> to vector<1x64xf32>
    %100 = vector.shape_cast %99 : vector<1x64xf32> to vector<1x64x1xf32>
    %101 = tpu.reciprocal %100 {approx = true} : vector<1x64x1xf32> -> vector<1x64x1xf32>
    %102 = vector.broadcast %101 : vector<1x64x1xf32> to vector<1x64x16xf32>
    %103 = arith.mulf %98, %102 : vector<1x64x16xf32>
    "tpu.trace_start"() <{level = 10 : i32, message = "bqk,bkd->bqd"}> : () -> ()
    %cst_26 = arith.constant dense<0.000000e+00> : vector<1x64x32xf32>
    %104 = tpu.matmul %103, %76, %cst_26 {dimension_numbers = #tpu.dot_dimension_numbers<[2], [1], [1], [2], [0, 0, 0, 1, 1, 2], [0], [0]>} : vector<1x64x16xf32>, vector<1x16x32xf32>, vector<1x64x32xf32> -> vector<1x64x32xf32>
    "tpu.trace_stop"() : () -> ()
    %105 = vector.extract_strided_slice %104 {offsets = [0, 0, 0], sizes = [1, 16, 32], strides = [1, 1, 1]} : vector<1x64x32xf32> to vector<1x16x32xf32>
    %106 = vector.shape_cast %7 : vector<1x32xf32> to vector<1x1x32xf32>
    %107 = vector.broadcast %106 : vector<1x1x32xf32> to vector<1x16x32xf32>
    %108 = arith.mulf %105, %107 : vector<1x16x32xf32>
    %cst_27 = arith.constant 0.000000e+00 : f32
    %109 = vector.broadcast %cst_27 : f32 to vector<1x16x32xf32>
    %110 = arith.addf %109, %108 : vector<1x16x32xf32>
    %111 = vector.extract_strided_slice %104 {offsets = [0, 16, 0], sizes = [1, 16, 32], strides = [1, 1, 1]} : vector<1x64x32xf32> to vector<1x16x32xf32>
    %112 = vector.shape_cast %14 : vector<1x32xf32> to vector<1x1x32xf32>
    %113 = vector.broadcast %112 : vector<1x1x32xf32> to vector<1x16x32xf32>
    %114 = arith.mulf %111, %113 : vector<1x16x32xf32>
    %115 = arith.addf %110, %114 : vector<1x16x32xf32>
    %116 = vector.extract_strided_slice %104 {offsets = [0, 32, 0], sizes = [1, 16, 32], strides = [1, 1, 1]} : vector<1x64x32xf32> to vector<1x16x32xf32>
    %117 = vector.shape_cast %21 : vector<1x32xf32> to vector<1x1x32xf32>
    %118 = vector.broadcast %117 : vector<1x1x32xf32> to vector<1x16x32xf32>
    %119 = arith.mulf %116, %118 : vector<1x16x32xf32>
    %120 = arith.addf %115, %119 : vector<1x16x32xf32>
    %121 = vector.extract_strided_slice %104 {offsets = [0, 48, 0], sizes = [1, 16, 32], strides = [1, 1, 1]} : vector<1x64x32xf32> to vector<1x16x32xf32>
    %122 = vector.shape_cast %28 : vector<1x32xf32> to vector<1x1x32xf32>
    %123 = vector.broadcast %122 : vector<1x1x32xf32> to vector<1x16x32xf32>
    %124 = arith.mulf %121, %123 : vector<1x16x32xf32>
    %125 = arith.addf %120, %124 : vector<1x16x32xf32>
    %126 = vector.shape_cast %125 : vector<1x16x32xf32> to vector<16x32xf32>
    %127 = arith.truncf %126 : vector<16x32xf32> to vector<16x32xbf16>
    %c0_28 = arith.constant 0 : index
    %c0_29 = arith.constant 0 : index
    %c0_30 = arith.constant 0 : index
    %128 = vector.load %arg7[%c0_28, %c0_29, %c0_30] : memref<2x32x32xbf16, #tpu.memory_space<vmem>>, vector<1x32x32xbf16>
    %129 = vector.shape_cast %128 : vector<1x32x32xbf16> to vector<32x32xbf16>
    %cst_31 = arith.constant dense<0.000000e+00> : vector<16x32xf32>
    %130 = tpu.matmul %127, %129, %cst_31 {dimension_numbers = #tpu.dot_dimension_numbers<[1], [0], [0], [1], [0, 0, 1, 1], [], []>} : vector<16x32xbf16>, vector<32x32xbf16>, vector<16x32xf32> -> vector<16x32xf32>
    %c0_32 = arith.constant 0 : index
    %c0_33 = arith.constant 0 : index
    %c0_34 = arith.constant 0 : index
    %131 = vector.load %arg8[%c0_32, %c0_33, %c0_34] : memref<2x1x32xf32, #tpu.memory_space<vmem>>, vector<1x1x32xf32>
    %132 = vector.shape_cast %131 : vector<1x1x32xf32> to vector<1x32xf32>
    %133 = vector.broadcast %132 : vector<1x32xf32> to vector<16x32xf32>
    %134 = arith.addf %130, %133 : vector<16x32xf32>
    %135 = arith.addf %134, %64 : vector<16x32xf32>
    %c0_35 = arith.constant 0 : index
    %c0_36 = arith.constant 0 : index
    %c0_37 = arith.constant 0 : index
    %136 = vector.load %arg9[%c0_35, %c0_36, %c0_37] : memref<2x1x32xf32, #tpu.memory_space<vmem>>, vector<1x1x32xf32>
    %137 = vector.shape_cast %136 : vector<1x1x32xf32> to vector<1x32xf32>
    %c0_38 = arith.constant 0 : index
    %c0_39 = arith.constant 0 : index
    %c0_40 = arith.constant 0 : index
    %138 = vector.load %arg10[%c0_38, %c0_39, %c0_40] : memref<2x1x32xf32, #tpu.memory_space<vmem>>, vector<1x1x32xf32>
    %139 = vector.shape_cast %138 : vector<1x1x32xf32> to vector<1x32xf32>
    %cst_41 = arith.constant dense<0.000000e+00> : vector<16xf32>
    %140 = vector.multi_reduction <add>, %135, %cst_41 [1] : vector<16x32xf32> to vector<16xf32>
    %141 = vector.shape_cast %140 : vector<16xf32> to vector<16x1xf32>
    %cst_42 = arith.constant 3.200000e+01 : f32
    %142 = vector.broadcast %cst_42 : f32 to vector<16x1xf32>
    %143 = arith.divf %141, %142 : vector<16x1xf32>
    %144 = vector.broadcast %143 : vector<16x1xf32> to vector<16x32xf32>
    %145 = arith.subf %135, %144 : vector<16x32xf32>
    %146 = arith.mulf %145, %145 : vector<16x32xf32>
    %cst_43 = arith.constant dense<0.000000e+00> : vector<16xf32>
    %147 = vector.multi_reduction <add>, %146, %cst_43 [1] : vector<16x32xf32> to vector<16xf32>
    %148 = vector.shape_cast %147 : vector<16xf32> to vector<16x1xf32>
    %cst_44 = arith.constant 3.200000e+01 : f32
    %149 = vector.broadcast %cst_44 : f32 to vector<16x1xf32>
    %150 = arith.divf %148, %149 : vector<16x1xf32>
    %151 = vector.broadcast %143 : vector<16x1xf32> to vector<16x32xf32>
    %152 = arith.subf %135, %151 : vector<16x32xf32>
    %cst_45 = arith.constant 9.99999996E-13 : f32
    %153 = vector.broadcast %cst_45 : f32 to vector<16x1xf32>
    %154 = arith.addf %150, %153 : vector<16x1xf32>
    %155 = math.rsqrt %154 : vector<16x1xf32>
    %156 = vector.broadcast %155 : vector<16x1xf32> to vector<16x32xf32>
    %157 = arith.mulf %152, %156 : vector<16x32xf32>
    %158 = vector.broadcast %137 : vector<1x32xf32> to vector<16x32xf32>
    %159 = arith.mulf %157, %158 : vector<16x32xf32>
    %160 = vector.broadcast %139 : vector<1x32xf32> to vector<16x32xf32>
    %161 = arith.addf %159, %160 : vector<16x32xf32>
    %162 = arith.truncf %161 : vector<16x32xf32> to vector<16x32xbf16>
    %c0_46 = arith.constant 0 : index
    %c0_47 = arith.constant 0 : index
    %c0_48 = arith.constant 0 : index
    %163 = vector.load %arg11[%c0_46, %c0_47, %c0_48] : memref<2x32x64xbf16, #tpu.memory_space<vmem>>, vector<1x32x64xbf16>
    %164 = vector.shape_cast %163 : vector<1x32x64xbf16> to vector<32x64xbf16>
    %cst_49 = arith.constant dense<0.000000e+00> : vector<16x64xf32>
    %165 = tpu.matmul %162, %164, %cst_49 {dimension_numbers = #tpu.dot_dimension_numbers<[1], [0], [0], [1], [0, 0, 1, 1], [], []>} : vector<16x32xbf16>, vector<32x64xbf16>, vector<16x64xf32> -> vector<16x64xf32>
    %c0_50 = arith.constant 0 : index
    %c0_51 = arith.constant 0 : index
    %c0_52 = arith.constant 0 : index
    %166 = vector.load %arg12[%c0_50, %c0_51, %c0_52] : memref<2x1x64xf32, #tpu.memory_space<vmem>>, vector<1x1x64xf32>
    %167 = vector.shape_cast %166 : vector<1x1x64xf32> to vector<1x64xf32>
    %168 = vector.broadcast %167 : vector<1x64xf32> to vector<16x64xf32>
    %169 = arith.addf %165, %168 : vector<16x64xf32>
    %cst_53 = arith.constant 5.000000e-01 : f32
    %170 = vector.broadcast %cst_53 : f32 to vector<16x64xf32>
    %171 = arith.mulf %170, %169 : vector<16x64xf32>
    %cst_54 = arith.constant 4.471500e-02 : f32
    %172 = vector.broadcast %cst_54 : f32 to vector<16x64xf32>
    %173 = arith.mulf %172, %169 : vector<16x64xf32>
    %174 = arith.mulf %173, %169 : vector<16x64xf32>
    %175 = arith.mulf %174, %169 : vector<16x64xf32>
    %176 = arith.addf %169, %175 : vector<16x64xf32>
    %cst_55 = arith.constant 0.797884583 : f32
    %177 = vector.broadcast %cst_55 : f32 to vector<16x64xf32>
    %178 = arith.mulf %177, %176 : vector<16x64xf32>
    %179 = math.tanh %178 : vector<16x64xf32>
    %cst_56 = arith.constant 1.000000e+00 : f32
    %180 = vector.broadcast %cst_56 : f32 to vector<16x64xf32>
    %181 = arith.addf %180, %179 : vector<16x64xf32>
    %182 = arith.mulf %171, %181 : vector<16x64xf32>
    %183 = arith.truncf %182 : vector<16x64xf32> to vector<16x64xbf16>
    %c0_57 = arith.constant 0 : index
    %c0_58 = arith.constant 0 : index
    %c0_59 = arith.constant 0 : index
    %184 = vector.load %arg13[%c0_57, %c0_58, %c0_59] : memref<2x64x32xbf16, #tpu.memory_space<vmem>>, vector<1x64x32xbf16>
    %185 = vector.shape_cast %184 : vector<1x64x32xbf16> to vector<64x32xbf16>
    %cst_60 = arith.constant dense<0.000000e+00> : vector<16x32xf32>
    %186 = tpu.matmul %183, %185, %cst_60 {dimension_numbers = #tpu.dot_dimension_numbers<[1], [0], [0], [1], [0, 0, 1, 1], [], []>} : vector<16x64xbf16>, vector<64x32xbf16>, vector<16x32xf32> -> vector<16x32xf32>
    %c0_61 = arith.constant 0 : index
    %c0_62 = arith.constant 0 : index
    %c0_63 = arith.constant 0 : index
    %187 = vector.load %arg14[%c0_61, %c0_62, %c0_63] : memref<2x1x32xf32, #tpu.memory_space<vmem>>, vector<1x1x32xf32>
    %188 = vector.shape_cast %187 : vector<1x1x32xf32> to vector<1x32xf32>
    %189 = vector.broadcast %188 : vector<1x32xf32> to vector<16x32xf32>
    %190 = arith.addf %186, %189 : vector<16x32xf32>
    %191 = arith.addf %190, %161 : vector<16x32xf32>
    %c0_64 = arith.constant 0 : index
    %c0_65 = arith.constant 0 : index
    %c0_66 = arith.constant 0 : index
    %192 = vector.load %arg15[%c0_64, %c0_65, %c0_66] : memref<2x1x32xf32, #tpu.memory_space<vmem>>, vector<1x1x32xf32>
    %193 = vector.shape_cast %192 : vector<1x1x32xf32> to vector<1x32xf32>
    %c0_67 = arith.constant 0 : index
    %c0_68 = arith.constant 0 : index
    %c0_69 = arith.constant 0 : index
    %194 = vector.load %arg16[%c0_67, %c0_68, %c0_69] : memref<2x1x32xf32, #tpu.memory_space<vmem>>, vector<1x1x32xf32>
    %195 = vector.shape_cast %194 : vector<1x1x32xf32> to vector<1x32xf32>
    %cst_70 = arith.constant dense<0.000000e+00> : vector<16xf32>
    %196 = vector.multi_reduction <add>, %191, %cst_70 [1] : vector<16x32xf32> to vector<16xf32>
    %197 = vector.shape_cast %196 : vector<16xf32> to vector<16x1xf32>
    %cst_71 = arith.constant 3.200000e+01 : f32
    %198 = vector.broadcast %cst_71 : f32 to vector<16x1xf32>
    %199 = arith.divf %197, %198 : vector<16x1xf32>
    %200 = vector.broadcast %199 : vector<16x1xf32> to vector<16x32xf32>
    %201 = arith.subf %191, %200 : vector<16x32xf32>
    %202 = arith.mulf %201, %201 : vector<16x32xf32>
    %cst_72 = arith.constant dense<0.000000e+00> : vector<16xf32>
    %203 = vector.multi_reduction <add>, %202, %cst_72 [1] : vector<16x32xf32> to vector<16xf32>
    %204 = vector.shape_cast %203 : vector<16xf32> to vector<16x1xf32>
    %cst_73 = arith.constant 3.200000e+01 : f32
    %205 = vector.broadcast %cst_73 : f32 to vector<16x1xf32>
    %206 = arith.divf %204, %205 : vector<16x1xf32>
    %207 = vector.broadcast %199 : vector<16x1xf32> to vector<16x32xf32>
    %208 = arith.subf %191, %207 : vector<16x32xf32>
    %cst_74 = arith.constant 9.99999996E-13 : f32
    %209 = vector.broadcast %cst_74 : f32 to vector<16x1xf32>
    %210 = arith.addf %206, %209 : vector<16x1xf32>
    %211 = math.rsqrt %210 : vector<16x1xf32>
    %212 = vector.broadcast %211 : vector<16x1xf32> to vector<16x32xf32>
    %213 = arith.mulf %208, %212 : vector<16x32xf32>
    %214 = vector.broadcast %193 : vector<1x32xf32> to vector<16x32xf32>
    %215 = arith.mulf %213, %214 : vector<16x32xf32>
    %216 = vector.broadcast %195 : vector<1x32xf32> to vector<16x32xf32>
    %217 = arith.addf %215, %216 : vector<16x32xf32>
    %218 = arith.truncf %217 : vector<16x32xf32> to vector<16x32xbf16>
    %c1 = arith.constant 1 : index
    %c0_75 = arith.constant 0 : index
    %c0_76 = arith.constant 0 : index
    %219 = vector.load %arg5[%c1, %c0_75, %c0_76] : memref<2x32x96xbf16, #tpu.memory_space<vmem>>, vector<1x32x96xbf16>
    %220 = vector.shape_cast %219 : vector<1x32x96xbf16> to vector<32x96xbf16>
    %cst_77 = arith.constant dense<0.000000e+00> : vector<16x96xf32>
    %221 = tpu.matmul %218, %220, %cst_77 {dimension_numbers = #tpu.dot_dimension_numbers<[1], [0], [0], [1], [0, 0, 1, 1], [], []>} : vector<16x32xbf16>, vector<32x96xbf16>, vector<16x96xf32> -> vector<16x96xf32>
    %c1_78 = arith.constant 1 : index
    %c0_79 = arith.constant 0 : index
    %c0_80 = arith.constant 0 : index
    %222 = vector.load %arg6[%c1_78, %c0_79, %c0_80] : memref<2x1x96xf32, #tpu.memory_space<vmem>>, vector<1x1x96xf32>
    %223 = vector.shape_cast %222 : vector<1x1x96xf32> to vector<1x96xf32>
    %224 = vector.broadcast %223 : vector<1x96xf32> to vector<16x96xf32>
    %225 = arith.addf %221, %224 : vector<16x96xf32>
    %226 = vector.shape_cast %225 : vector<16x96xf32> to vector<1x16x96xf32>
    %227 = vector.extract_strided_slice %226 {offsets = [0, 0, 0], sizes = [1, 16, 32], strides = [1, 1, 1]} : vector<1x16x96xf32> to vector<1x16x32xf32>
    %228 = vector.extract_strided_slice %226 {offsets = [0, 0, 32], sizes = [1, 16, 32], strides = [1, 1, 1]} : vector<1x16x96xf32> to vector<1x16x32xf32>
    %229 = vector.extract_strided_slice %226 {offsets = [0, 0, 64], sizes = [1, 16, 32], strides = [1, 1, 1]} : vector<1x16x96xf32> to vector<1x16x32xf32>
    %230 = vector.shape_cast %7 : vector<1x32xf32> to vector<1x1x32xf32>
    %231 = vector.broadcast %230 : vector<1x1x32xf32> to vector<1x16x32xf32>
    %232 = arith.mulf %227, %231 : vector<1x16x32xf32>
    %233 = vector.shape_cast %14 : vector<1x32xf32> to vector<1x1x32xf32>
    %234 = vector.broadcast %233 : vector<1x1x32xf32> to vector<1x16x32xf32>
    %235 = arith.mulf %227, %234 : vector<1x16x32xf32>
    %236 = vector.shape_cast %21 : vector<1x32xf32> to vector<1x1x32xf32>
    %237 = vector.broadcast %236 : vector<1x1x32xf32> to vector<1x16x32xf32>
    %238 = arith.mulf %227, %237 : vector<1x16x32xf32>
    %239 = vector.shape_cast %28 : vector<1x32xf32> to vector<1x1x32xf32>
    %240 = vector.broadcast %239 : vector<1x1x32xf32> to vector<1x16x32xf32>
    %241 = arith.mulf %227, %240 : vector<1x16x32xf32>
    %242 = tpu.concatenate %232, %235, %238, %241 in 1 : vector<1x16x32xf32>, vector<1x16x32xf32>, vector<1x16x32xf32>, vector<1x16x32xf32> -> vector<1x64x32xf32>
    "tpu.trace_start"() <{level = 10 : i32, message = "bqd,bkd->bqk"}> : () -> ()
    %cst_81 = arith.constant dense<0.000000e+00> : vector<1x64x16xf32>
    %243 = tpu.matmul %242, %228, %cst_81 {dimension_numbers = #tpu.dot_dimension_numbers<[2], [2], [1], [1], [0, 0, 0, 1, 1, 1], [0], [0]>} : vector<1x64x32xf32>, vector<1x16x32xf32>, vector<1x64x16xf32> -> vector<1x64x16xf32>
    "tpu.trace_stop"() : () -> ()
    %244 = vector.shape_cast %34 : vector<1x16xf32> to vector<1x1x16xf32>
    %245 = vector.broadcast %244 : vector<1x1x16xf32> to vector<1x64x16xf32>
    %246 = arith.addf %243, %245 : vector<1x64x16xf32>
    %cst_82 = arith.constant dense<0xFF800000> : vector<1x64xf32>
    %247 = vector.multi_reduction <maximumf>, %246, %cst_82 [2] : vector<1x64x16xf32> to vector<1x64xf32>
    %248 = vector.shape_cast %247 : vector<1x64xf32> to vector<1x64x1xf32>
    %249 = vector.broadcast %248 : vector<1x64x1xf32> to vector<1x64x16xf32>
    %250 = arith.subf %246, %249 : vector<1x64x16xf32>
    %251 = math.exp %250 : vector<1x64x16xf32>
    %cst_83 = arith.constant dense<0.000000e+00> : vector<1x64xf32>
    %252 = vector.multi_reduction <add>, %251, %cst_83 [2] : vector<1x64x16xf32> to vector<1x64xf32>
    %253 = vector.shape_cast %252 : vector<1x64xf32> to vector<1x64x1xf32>
    %254 = tpu.reciprocal %253 {approx = true} : vector<1x64x1xf32> -> vector<1x64x1xf32>
    %255 = vector.broadcast %254 : vector<1x64x1xf32> to vector<1x64x16xf32>
    %256 = arith.mulf %251, %255 : vector<1x64x16xf32>
    "tpu.trace_start"() <{level = 10 : i32, message = "bqk,bkd->bqd"}> : () -> ()
    %cst_84 = arith.constant dense<0.000000e+00> : vector<1x64x32xf32>
    %257 = tpu.matmul %256, %229, %cst_84 {dimension_numbers = #tpu.dot_dimension_numbers<[2], [1], [1], [2], [0, 0, 0, 1, 1, 2], [0], [0]>} : vector<1x64x16xf32>, vector<1x16x32xf32>, vector<1x64x32xf32> -> vector<1x64x32xf32>
    "tpu.trace_stop"() : () -> ()
    %258 = vector.extract_strided_slice %257 {offsets = [0, 0, 0], sizes = [1, 16, 32], strides = [1, 1, 1]} : vector<1x64x32xf32> to vector<1x16x32xf32>
    %259 = vector.shape_cast %7 : vector<1x32xf32> to vector<1x1x32xf32>
    %260 = vector.broadcast %259 : vector<1x1x32xf32> to vector<1x16x32xf32>
    %261 = arith.mulf %258, %260 : vector<1x16x32xf32>
    %cst_85 = arith.constant 0.000000e+00 : f32
    %262 = vector.broadcast %cst_85 : f32 to vector<1x16x32xf32>
    %263 = arith.addf %262, %261 : vector<1x16x32xf32>
    %264 = vector.extract_strided_slice %257 {offsets = [0, 16, 0], sizes = [1, 16, 32], strides = [1, 1, 1]} : vector<1x64x32xf32> to vector<1x16x32xf32>
    %265 = vector.shape_cast %14 : vector<1x32xf32> to vector<1x1x32xf32>
    %266 = vector.broadcast %265 : vector<1x1x32xf32> to vector<1x16x32xf32>
    %267 = arith.mulf %264, %266 : vector<1x16x32xf32>
    %268 = arith.addf %263, %267 : vector<1x16x32xf32>
    %269 = vector.extract_strided_slice %257 {offsets = [0, 32, 0], sizes = [1, 16, 32], strides = [1, 1, 1]} : vector<1x64x32xf32> to vector<1x16x32xf32>
    %270 = vector.shape_cast %21 : vector<1x32xf32> to vector<1x1x32xf32>
    %271 = vector.broadcast %270 : vector<1x1x32xf32> to vector<1x16x32xf32>
    %272 = arith.mulf %269, %271 : vector<1x16x32xf32>
    %273 = arith.addf %268, %272 : vector<1x16x32xf32>
    %274 = vector.extract_strided_slice %257 {offsets = [0, 48, 0], sizes = [1, 16, 32], strides = [1, 1, 1]} : vector<1x64x32xf32> to vector<1x16x32xf32>
    %275 = vector.shape_cast %28 : vector<1x32xf32> to vector<1x1x32xf32>
    %276 = vector.broadcast %275 : vector<1x1x32xf32> to vector<1x16x32xf32>
    %277 = arith.mulf %274, %276 : vector<1x16x32xf32>
    %278 = arith.addf %273, %277 : vector<1x16x32xf32>
    %279 = vector.shape_cast %278 : vector<1x16x32xf32> to vector<16x32xf32>
    %280 = arith.truncf %279 : vector<16x32xf32> to vector<16x32xbf16>
    %c1_86 = arith.constant 1 : index
    %c0_87 = arith.constant 0 : index
    %c0_88 = arith.constant 0 : index
    %281 = vector.load %arg7[%c1_86, %c0_87, %c0_88] : memref<2x32x32xbf16, #tpu.memory_space<vmem>>, vector<1x32x32xbf16>
    %282 = vector.shape_cast %281 : vector<1x32x32xbf16> to vector<32x32xbf16>
    %cst_89 = arith.constant dense<0.000000e+00> : vector<16x32xf32>
    %283 = tpu.matmul %280, %282, %cst_89 {dimension_numbers = #tpu.dot_dimension_numbers<[1], [0], [0], [1], [0, 0, 1, 1], [], []>} : vector<16x32xbf16>, vector<32x32xbf16>, vector<16x32xf32> -> vector<16x32xf32>
    %c1_90 = arith.constant 1 : index
    %c0_91 = arith.constant 0 : index
    %c0_92 = arith.constant 0 : index
    %284 = vector.load %arg8[%c1_90, %c0_91, %c0_92] : memref<2x1x32xf32, #tpu.memory_space<vmem>>, vector<1x1x32xf32>
    %285 = vector.shape_cast %284 : vector<1x1x32xf32> to vector<1x32xf32>
    %286 = vector.broadcast %285 : vector<1x32xf32> to vector<16x32xf32>
    %287 = arith.addf %283, %286 : vector<16x32xf32>
    %288 = arith.addf %287, %217 : vector<16x32xf32>
    %c1_93 = arith.constant 1 : index
    %c0_94 = arith.constant 0 : index
    %c0_95 = arith.constant 0 : index
    %289 = vector.load %arg9[%c1_93, %c0_94, %c0_95] : memref<2x1x32xf32, #tpu.memory_space<vmem>>, vector<1x1x32xf32>
    %290 = vector.shape_cast %289 : vector<1x1x32xf32> to vector<1x32xf32>
    %c1_96 = arith.constant 1 : index
    %c0_97 = arith.constant 0 : index
    %c0_98 = arith.constant 0 : index
    %291 = vector.load %arg10[%c1_96, %c0_97, %c0_98] : memref<2x1x32xf32, #tpu.memory_space<vmem>>, vector<1x1x32xf32>
    %292 = vector.shape_cast %291 : vector<1x1x32xf32> to vector<1x32xf32>
    %cst_99 = arith.constant dense<0.000000e+00> : vector<16xf32>
    %293 = vector.multi_reduction <add>, %288, %cst_99 [1] : vector<16x32xf32> to vector<16xf32>
    %294 = vector.shape_cast %293 : vector<16xf32> to vector<16x1xf32>
    %cst_100 = arith.constant 3.200000e+01 : f32
    %295 = vector.broadcast %cst_100 : f32 to vector<16x1xf32>
    %296 = arith.divf %294, %295 : vector<16x1xf32>
    %297 = vector.broadcast %296 : vector<16x1xf32> to vector<16x32xf32>
    %298 = arith.subf %288, %297 : vector<16x32xf32>
    %299 = arith.mulf %298, %298 : vector<16x32xf32>
    %cst_101 = arith.constant dense<0.000000e+00> : vector<16xf32>
    %300 = vector.multi_reduction <add>, %299, %cst_101 [1] : vector<16x32xf32> to vector<16xf32>
    %301 = vector.shape_cast %300 : vector<16xf32> to vector<16x1xf32>
    %cst_102 = arith.constant 3.200000e+01 : f32
    %302 = vector.broadcast %cst_102 : f32 to vector<16x1xf32>
    %303 = arith.divf %301, %302 : vector<16x1xf32>
    %304 = vector.broadcast %296 : vector<16x1xf32> to vector<16x32xf32>
    %305 = arith.subf %288, %304 : vector<16x32xf32>
    %cst_103 = arith.constant 9.99999996E-13 : f32
    %306 = vector.broadcast %cst_103 : f32 to vector<16x1xf32>
    %307 = arith.addf %303, %306 : vector<16x1xf32>
    %308 = math.rsqrt %307 : vector<16x1xf32>
    %309 = vector.broadcast %308 : vector<16x1xf32> to vector<16x32xf32>
    %310 = arith.mulf %305, %309 : vector<16x32xf32>
    %311 = vector.broadcast %290 : vector<1x32xf32> to vector<16x32xf32>
    %312 = arith.mulf %310, %311 : vector<16x32xf32>
    %313 = vector.broadcast %292 : vector<1x32xf32> to vector<16x32xf32>
    %314 = arith.addf %312, %313 : vector<16x32xf32>
    %315 = arith.truncf %314 : vector<16x32xf32> to vector<16x32xbf16>
    %c1_104 = arith.constant 1 : index
    %c0_105 = arith.constant 0 : index
    %c0_106 = arith.constant 0 : index
    %316 = vector.load %arg11[%c1_104, %c0_105, %c0_106] : memref<2x32x64xbf16, #tpu.memory_space<vmem>>, vector<1x32x64xbf16>
    %317 = vector.shape_cast %316 : vector<1x32x64xbf16> to vector<32x64xbf16>
    %cst_107 = arith.constant dense<0.000000e+00> : vector<16x64xf32>
    %318 = tpu.matmul %315, %317, %cst_107 {dimension_numbers = #tpu.dot_dimension_numbers<[1], [0], [0], [1], [0, 0, 1, 1], [], []>} : vector<16x32xbf16>, vector<32x64xbf16>, vector<16x64xf32> -> vector<16x64xf32>
    %c1_108 = arith.constant 1 : index
    %c0_109 = arith.constant 0 : index
    %c0_110 = arith.constant 0 : index
    %319 = vector.load %arg12[%c1_108, %c0_109, %c0_110] : memref<2x1x64xf32, #tpu.memory_space<vmem>>, vector<1x1x64xf32>
    %320 = vector.shape_cast %319 : vector<1x1x64xf32> to vector<1x64xf32>
    %321 = vector.broadcast %320 : vector<1x64xf32> to vector<16x64xf32>
    %322 = arith.addf %318, %321 : vector<16x64xf32>
    %cst_111 = arith.constant 5.000000e-01 : f32
    %323 = vector.broadcast %cst_111 : f32 to vector<16x64xf32>
    %324 = arith.mulf %323, %322 : vector<16x64xf32>
    %cst_112 = arith.constant 4.471500e-02 : f32
    %325 = vector.broadcast %cst_112 : f32 to vector<16x64xf32>
    %326 = arith.mulf %325, %322 : vector<16x64xf32>
    %327 = arith.mulf %326, %322 : vector<16x64xf32>
    %328 = arith.mulf %327, %322 : vector<16x64xf32>
    %329 = arith.addf %322, %328 : vector<16x64xf32>
    %cst_113 = arith.constant 0.797884583 : f32
    %330 = vector.broadcast %cst_113 : f32 to vector<16x64xf32>
    %331 = arith.mulf %330, %329 : vector<16x64xf32>
    %332 = math.tanh %331 : vector<16x64xf32>
    %cst_114 = arith.constant 1.000000e+00 : f32
    %333 = vector.broadcast %cst_114 : f32 to vector<16x64xf32>
    %334 = arith.addf %333, %332 : vector<16x64xf32>
    %335 = arith.mulf %324, %334 : vector<16x64xf32>
    %336 = arith.truncf %335 : vector<16x64xf32> to vector<16x64xbf16>
    %c1_115 = arith.constant 1 : index
    %c0_116 = arith.constant 0 : index
    %c0_117 = arith.constant 0 : index
    %337 = vector.load %arg13[%c1_115, %c0_116, %c0_117] : memref<2x64x32xbf16, #tpu.memory_space<vmem>>, vector<1x64x32xbf16>
    %338 = vector.shape_cast %337 : vector<1x64x32xbf16> to vector<64x32xbf16>
    %cst_118 = arith.constant dense<0.000000e+00> : vector<16x32xf32>
    %339 = tpu.matmul %336, %338, %cst_118 {dimension_numbers = #tpu.dot_dimension_numbers<[1], [0], [0], [1], [0, 0, 1, 1], [], []>} : vector<16x64xbf16>, vector<64x32xbf16>, vector<16x32xf32> -> vector<16x32xf32>
    %c1_119 = arith.constant 1 : index
    %c0_120 = arith.constant 0 : index
    %c0_121 = arith.constant 0 : index
    %340 = vector.load %arg14[%c1_119, %c0_120, %c0_121] : memref<2x1x32xf32, #tpu.memory_space<vmem>>, vector<1x1x32xf32>
    %341 = vector.shape_cast %340 : vector<1x1x32xf32> to vector<1x32xf32>
    %342 = vector.broadcast %341 : vector<1x32xf32> to vector<16x32xf32>
    %343 = arith.addf %339, %342 : vector<16x32xf32>
    %344 = arith.addf %343, %314 : vector<16x32xf32>
    %c1_122 = arith.constant 1 : index
    %c0_123 = arith.constant 0 : index
    %c0_124 = arith.constant 0 : index
    %345 = vector.load %arg15[%c1_122, %c0_123, %c0_124] : memref<2x1x32xf32, #tpu.memory_space<vmem>>, vector<1x1x32xf32>
    %346 = vector.shape_cast %345 : vector<1x1x32xf32> to vector<1x32xf32>
    %c1_125 = arith.constant 1 : index
    %c0_126 = arith.constant 0 : index
    %c0_127 = arith.constant 0 : index
    %347 = vector.load %arg16[%c1_125, %c0_126, %c0_127] : memref<2x1x32xf32, #tpu.memory_space<vmem>>, vector<1x1x32xf32>
    %348 = vector.shape_cast %347 : vector<1x1x32xf32> to vector<1x32xf32>
    %cst_128 = arith.constant dense<0.000000e+00> : vector<16xf32>
    %349 = vector.multi_reduction <add>, %344, %cst_128 [1] : vector<16x32xf32> to vector<16xf32>
    %350 = vector.shape_cast %349 : vector<16xf32> to vector<16x1xf32>
    %cst_129 = arith.constant 3.200000e+01 : f32
    %351 = vector.broadcast %cst_129 : f32 to vector<16x1xf32>
    %352 = arith.divf %350, %351 : vector<16x1xf32>
    %353 = vector.broadcast %352 : vector<16x1xf32> to vector<16x32xf32>
    %354 = arith.subf %344, %353 : vector<16x32xf32>
    %355 = arith.mulf %354, %354 : vector<16x32xf32>
    %cst_130 = arith.constant dense<0.000000e+00> : vector<16xf32>
    %356 = vector.multi_reduction <add>, %355, %cst_130 [1] : vector<16x32xf32> to vector<16xf32>
    %357 = vector.shape_cast %356 : vector<16xf32> to vector<16x1xf32>
    %cst_131 = arith.constant 3.200000e+01 : f32
    %358 = vector.broadcast %cst_131 : f32 to vector<16x1xf32>
    %359 = arith.divf %357, %358 : vector<16x1xf32>
    %360 = vector.broadcast %352 : vector<16x1xf32> to vector<16x32xf32>
    %361 = arith.subf %344, %360 : vector<16x32xf32>
    %cst_132 = arith.constant 9.99999996E-13 : f32
    %362 = vector.broadcast %cst_132 : f32 to vector<16x1xf32>
    %363 = arith.addf %359, %362 : vector<16x1xf32>
    %364 = math.rsqrt %363 : vector<16x1xf32>
    %365 = vector.broadcast %364 : vector<16x1xf32> to vector<16x32xf32>
    %366 = arith.mulf %361, %365 : vector<16x32xf32>
    %367 = vector.broadcast %346 : vector<1x32xf32> to vector<16x32xf32>
    %368 = arith.mulf %366, %367 : vector<16x32xf32>
    %369 = vector.broadcast %348 : vector<1x32xf32> to vector<16x32xf32>
    %370 = arith.addf %368, %369 : vector<16x32xf32>
    %371 = arith.truncf %370 : vector<16x32xf32> to vector<16x32xbf16>
    %c0_133 = arith.constant 0 : index
    %c0_134 = arith.constant 0 : index
    %372 = vector.load %arg17[%c0_133, %c0_134] : memref<32x128xbf16, #tpu.memory_space<vmem>>, vector<32x128xbf16>
    %cst_135 = arith.constant dense<0.000000e+00> : vector<16x128xf32>
    %373 = tpu.matmul %371, %372, %cst_135 {dimension_numbers = #tpu.dot_dimension_numbers<[1], [0], [0], [1], [0, 0, 1, 1], [], []>} : vector<16x32xbf16>, vector<32x128xbf16>, vector<16x128xf32> -> vector<16x128xf32>
    %c0_136 = arith.constant 0 : index
    %c0_137 = arith.constant 0 : index
    %374 = vector.load %arg18[%c0_136, %c0_137] : memref<1x128xf32, #tpu.memory_space<vmem>>, vector<1x128xf32>
    %375 = vector.broadcast %374 : vector<1x128xf32> to vector<16x128xf32>
    %376 = arith.addf %373, %375 : vector<16x128xf32>
    %c0_138 = arith.constant 0 : index
    %c0_139 = arith.constant 0 : index
    %377 = vector.load %arg19[%c0_138, %c0_139] : memref<16x128xf32, #tpu.memory_space<vmem>>, vector<16x128xf32>
    tpu.vector_store %arg19[%c0_138, %c0_139], %376 {strides = array<i32>} : memref<16x128xf32, #tpu.memory_space<vmem>>, vector<16x128xf32>,
    return
  }
  func.func @transform_0(%arg0: i32) -> (i32, i32) {
    %c0_i32 = arith.constant 0 : i32
    %c0_i32_0 = arith.constant 0 : i32
    return %arg0, %c0_i32 : i32, i32
  }
  func.func @transform_1(%arg0: i32) -> (i32, i32) {
    %c0_i32 = arith.constant 0 : i32
    %c0_i32_0 = arith.constant 0 : i32
    %c0_i32_1 = arith.constant 0 : i32
    return %c0_i32, %c0_i32_0 : i32, i32
  }
  func.func @transform_2(%arg0: i32) -> (i32, i32) {
    %c0_i32 = arith.constant 0 : i32
    %c0_i32_0 = arith.constant 0 : i32
    %c0_i32_1 = arith.constant 0 : i32
    return %c0_i32, %c0_i32_0 : i32, i32
  }
  func.func @transform_3(%arg0: i32) -> (i32, i32) {
    %c0_i32 = arith.constant 0 : i32
    %c0_i32_0 = arith.constant 0 : i32
    %c0_i32_1 = arith.constant 0 : i32
    return %c0_i32, %c0_i32_0 : i32, i32
  }
  func.func @transform_4(%arg0: i32) -> (i32, i32, i32) {
    %c0_i32 = arith.constant 0 : i32
    %c0_i32_0 = arith.constant 0 : i32
    %c0_i32_1 = arith.constant 0 : i32
    %c0_i32_2 = arith.constant 0 : i32
    return %c0_i32, %c0_i32_0, %c0_i32_1 : i32, i32, i32
  }
  func.func @transform_5(%arg0: i32) -> (i32, i32, i32) {
    %c0_i32 = arith.constant 0 : i32
    %c0_i32_0 = arith.constant 0 : i32
    %c0_i32_1 = arith.constant 0 : i32
    %c0_i32_2 = arith.constant 0 : i32
    return %c0_i32, %c0_i32_0, %c0_i32_1 : i32, i32, i32
  }
  func.func @transform_6(%arg0: i32) -> (i32, i32, i32) {
    %c0_i32 = arith.constant 0 : i32
    %c0_i32_0 = arith.constant 0 : i32
    %c0_i32_1 = arith.constant 0 : i32
    %c0_i32_2 = arith.constant 0 : i32
    return %c0_i32, %c0_i32_0, %c0_i32_1 : i32, i32, i32
  }
  func.func @transform_7(%arg0: i32) -> (i32, i32, i32) {
    %c0_i32 = arith.constant 0 : i32
    %c0_i32_0 = arith.constant 0 : i32
    %c0_i32_1 = arith.constant 0 : i32
    %c0_i32_2 = arith.constant 0 : i32
    return %c0_i32, %c0_i32_0, %c0_i32_1 : i32, i32, i32
  }
  func.func @transform_8(%arg0: i32) -> (i32, i32, i32) {
    %c0_i32 = arith.constant 0 : i32
    %c0_i32_0 = arith.constant 0 : i32
    %c0_i32_1 = arith.constant 0 : i32
    %c0_i32_2 = arith.constant 0 : i32
    return %c0_i32, %c0_i32_0, %c0_i32_1 : i32, i32, i32
  }
  func.func @transform_9(%arg0: i32) -> (i32, i32, i32) {
    %c0_i32 = arith.constant 0 : i32
    %c0_i32_0 = arith.constant 0 : i32
    %c0_i32_1 = arith.constant 0 : i32
    %c0_i32_2 = arith.constant 0 : i32
    return %c0_i32, %c0_i32_0, %c0_i32_1 : i32, i32, i32
  }
  func.func @transform_10(%arg0: i32) -> (i32, i32, i32) {
    %c0_i32 = arith.constant 0 : i32
    %c0_i32_0 = arith.constant 0 : i32
    %c0_i32_1 = arith.constant 0 : i32
    %c0_i32_2 = arith.constant 0 : i32
    return %c0_i32, %c0_i32_0, %c0_i32_1 : i32, i32, i32
  }
  func.func @transform_11(%arg0: i32) -> (i32, i32, i32) {
    %c0_i32 = arith.constant 0 : i32
    %c0_i32_0 = arith.constant 0 : i32
    %c0_i32_1 = arith.constant 0 : i32
    %c0_i32_2 = arith.constant 0 : i32
    return %c0_i32, %c0_i32_0, %c0_i32_1 : i32, i32, i32
  }
  func.func @transform_12(%arg0: i32) -> (i32, i32, i32) {
    %c0_i32 = arith.constant 0 : i32
    %c0_i32_0 = arith.constant 0 : i32
    %c0_i32_1 = arith.constant 0 : i32
    %c0_i32_2 = arith.constant 0 : i32
    return %c0_i32, %c0_i32_0, %c0_i32_1 : i32, i32, i32
  }
  func.func @transform_13(%arg0: i32) -> (i32, i32, i32) {
    %c0_i32 = arith.constant 0 : i32
    %c0_i32_0 = arith.constant 0 : i32
    %c0_i32_1 = arith.constant 0 : i32
    %c0_i32_2 = arith.constant 0 : i32
    return %c0_i32, %c0_i32_0, %c0_i32_1 : i32, i32, i32
  }
  func.func @transform_14(%arg0: i32) -> (i32, i32, i32) {
    %c0_i32 = arith.constant 0 : i32
    %c0_i32_0 = arith.constant 0 : i32
    %c0_i32_1 = arith.constant 0 : i32
    %c0_i32_2 = arith.constant 0 : i32
    return %c0_i32, %c0_i32_0, %c0_i32_1 : i32, i32, i32
  }
  func.func @transform_15(%arg0: i32) -> (i32, i32, i32) {
    %c0_i32 = arith.constant 0 : i32
    %c0_i32_0 = arith.constant 0 : i32
    %c0_i32_1 = arith.constant 0 : i32
    %c0_i32_2 = arith.constant 0 : i32
    return %c0_i32, %c0_i32_0, %c0_i32_1 : i32, i32, i32
  }
  func.func @transform_16(%arg0: i32) -> (i32, i32) {
    %c0_i32 = arith.constant 0 : i32
    %c0_i32_0 = arith.constant 0 : i32
    %c0_i32_1 = arith.constant 0 : i32
    return %c0_i32, %c0_i32_0 : i32, i32
  }
  func.func @transform_17(%arg0: i32) -> (i32, i32) {
    %c0_i32 = arith.constant 0 : i32
    %c0_i32_0 = arith.constant 0 : i32
    %c0_i32_1 = arith.constant 0 : i32
    return %c0_i32, %c0_i32_0 : i32, i32
  }
  func.func @transform_18(%arg0: i32) -> (i32, i32) {
    %c0_i32 = arith.constant 0 : i32
    %c0_i32_0 = arith.constant 0 : i32
    return %arg0, %c0_i32 : i32, i32
  }
}

</mosaic_0001>

<bundles_post_ra>
// kernel: tpu_custom_call.1
= control target key start
LH: loop header
LB: loop body
LE: loop exit
PB: predicated region body
PF: predicated region fallthrough
CT: control target
= control target key end

     0   :  { %s4151_s0 = inlined_call_operand.vmem [shape: f32[32,32], index: 0, kind: input, shape index: {}]   ;;  %s4152_s1 = inlined_call_operand.hbm [shape: f32[16,32], index: 1, kind: input, shape index: {}]   ;;  %s4153_s2 = inlined_call_operand.hbm [shape: f32[1,32], index: 2, kind: input, shape index: {}]   ;;  %s4154_s3 = inlined_call_operand.hbm [shape: f32[1,32], index: 3, kind: input, shape index: {}]   ;;  %s4155_s4 = inlined_call_operand.vmem [shape: bf16[2,32,96], index: 4, kind: input, shape index: {}]   ;;  %s4156_s5 = inlined_call_operand.hbm [shape: f32[2,1,96], index: 5, kind: input, shape index: {}]   ;;  %s4157_s6 = inlined_call_operand.vmem [shape: bf16[2,32,32], index: 6, kind: input, shape index: {}]   ;;  %s4158_s7 = inlined_call_operand.hbm [shape: f32[2,1,32], index: 7, kind: input, shape index: {}]   ;;  %s4159_s8 = inlined_call_operand.hbm [shape: f32[2,1,32], index: 8, kind: input, shape index: {}]   ;;  %s4160_s9 = inlined_call_operand.hbm [shape: f32[2,1,32], index: 9, kind: input, shape index: {}]   ;;  %s4161_s10 = inlined_call_operand.hbm [shape: bf16[2,32,64], index: 10, kind: input, shape index: {}]   ;;  %s4162_s11 = inlined_call_operand.vmem [shape: f32[2,1,64], index: 11, kind: input, shape index: {}]   ;;  %s4163_s12 = inlined_call_operand.vmem [shape: bf16[2,64,32], index: 12, kind: input, shape index: {}]   ;;  %s4164_s13 = inlined_call_operand.vmem [shape: f32[2,1,32], index: 13, kind: input, shape index: {}]   ;;  %s4165_s14 = inlined_call_operand.vmem [shape: f32[2,1,32], index: 14, kind: input, shape index: {}]   ;;  %s4166_s15 = inlined_call_operand.vmem [shape: f32[2,1,32], index: 15, kind: input, shape index: {}]   ;;  %s4167_s16 = inlined_call_operand.vmem [shape: bf16[32,128], index: 16, kind: input, shape index: {}]   ;;  %s4168_s17 = inlined_call_operand.vmem [shape: f32[1,128], index: 17, kind: input, shape index: {}]   ;;  %s4169_s18 = inlined_call_operand.hbm [shape: f32[32,128], index: 18, kind: output, shape index: {}]  }
   0x1   :  { %4184 = sst [smem:[#allocation29_spill]] %s4151_s0 }
   0x2   :  { %4185 = sst [smem:[#allocation30_spill]] %s4152_s1 }
   0x3   :  { %4186 = sst [smem:[#allocation31_spill]] %s4153_s2 }
   0x4   :  { %4187 = sst [smem:[#allocation32_spill]] %s4156_s5 }
   0x5   :  { %4188 = sst [smem:[#allocation33_spill]] %s4159_s8 }
   0x6   :  { %4189 = sst [smem:[#allocation34_spill]] %s4169_s18 }
   0x7   :  { %23 = vsyncpa [#allocation3], 0 }
   0x8   :  { %24 = vsyncpa [#allocation6], 0 }
   0x9   :  { %25 = vsyncpa [#allocation9], 0 }
   0xa   :  { %26 = vsyncpa [#allocation12], 0 }
   0xb   :  { %27 = vsyncpa [#allocation15], 0 }
   0xc   :  { %28 = vsyncpa [#allocation4], 0 }
   0xd   :  { %30 = vsyncpa [#allocation4 + $0x1], 0  ;;  %s3586_s27 = smov 0   ;;  %s3588_s28 = smov 0  }
   0xe   :  { %s3590_s29 = smov 0   ;;  %s3592_s30 = smov 0  }
   0xf LB: > { %4190 = sst [smem:[#allocation23_spill]] %s3455_s27  ;;  %s3607_s0 = sadd.s32 4294967295, %s3467_s30   ;;  %s3467_s30 = sphi %s3592_s30, %s4226_s30   ;;  %s3463_s29 = sphi %s3590_s29, %s4228_s29   ;;  %s3459_s28 = sphi %s3588_s28, %s4230_s28   ;;  %s3455_s27 = sphi %s3586_s27, %s4229_s27  }
  0x10   : > { %4191 = sst [smem:[#allocation24_spill]] %s3463_s29  ;;  %s2574_s19 = sadd.s32 4294967294, %s3467_s30  }
  0x11   : > { %4192 = sst [smem:[#allocation25_spill]] %s3467_s30  ;;  %s3611_s1 = sadd.s32 1, %s3467_s30  }
  0x12   : > { %4193 = sst [smem:[#allocation26_spill]] %s3611_s1  ;;  %s426_s20 = sadd.s32 1, %s3463_s29 }
  0x13   : > { %s423_s21 = ssub.s32 %s3467_s30, %s3611_s1  ;;  %p436_p0 = scmp.ne.s32.totalorder %s3463_s29, %s3459_s28 }
  0x14   : > { %p424_p1 = scmp.eq.s32.totalorder %s423_s21, 0  ;;  %p437_p2 = scmp.eq.s32.totalorder %s3607_s0, 1 }
  0x15   : > { %p442_p3 = scmp.ne.s32.totalorder %s3459_s28, %s3455_s27  ;;  %p443_p4 = scmp.eq.s32.totalorder %s2574_s19, 1 }
  0x16   : > { %s3622_s22 = scalar_select %p424_p1, %s3463_s29, %s426_s20  }
  0x17   : > { %p3624_p5 = por %p437_p2, %p436_p0  ;;  %p3628_p6 = por %p443_p4, %p442_p3 }
  0x18   : > { %4194 = sst [smem:[#allocation27_spill]] %s3622_s22  ;;  %p2575_p7 = scmp.ge.s32.totalorder %s3467_s30, 1 }
  0x19   : > { %s4195_s2 = scalar_select %p3624_p5, 1, 0 }
  0x1a   : > { %s4196_s23 = scalar_select %p3628_p6, 1, 0 }
  0x1b   : > { %p450_p8 = scmp.lt.s32.totalorder %s3467_s30, 3  ;;  %p4176_p9 = scmp.eq.s32.totalorder %s3607_s0, 0 }
  0x1c   : > { %4197 = sst [smem:[#allocation28_spill]] %s4196_s23  ;;  %s3469_s25 = smov [#allocation5]  }
  0x1d   : > { %p3635_p10 = pnand %p2575_p7, %p450_p8  ;;  %s476_s26 = sshll.u32 %s3469_s25, 4  ;;  %s477_s26 = int_to_ptr.vmem [resolvable:$true] %s476_s26 }
  0x1e   : > { %s3470_s19 = smov [#allocation8]   ;;  %s3471_s22 = smov [#allocation11]  }
  0x1f   : > { %s4198_s24 = scalar_select %p3635_p10, 1, 0 }
  0x20   : > { %p2966_p11 = pneg %p3635_p10  ;;  %s500_s20 = sshll.u32 %s3470_s19, 4  ;;  %s3647_s20 = int_to_ptr.vmem [resolvable:$true] %s500_s20 }
  0x21   : > { %s529_s29 = sshll.u32 %s3471_s22, 4  ;;  %s3190_s25 = scalar_lea.vmem %s477_s26, 16  ;;  %s530_s29 = int_to_ptr.vmem [resolvable:$true] %s529_s29 }
  0x22   : > { %p3643_p12 = pnand %p4176_p9, %p2966_p11  ;;  %p3191_p0 = scmp.ne.s32.totalorder %s477_s26, %s3190_s25 }
  0x23   : > { %s3197_s19 = scalar_lea.vmem %s477_s26, 32  ;;  %p3198_p3 = scmp.lt.s32.totalorder %s477_s26, %s477_s26 }
  0x24   : > { %p3651_p13 = pneg %p3643_p12  ;;  %p3199_p4 = scmp.lt.s32.totalorder %s3197_s19, %s3190_s25 }
  0x26   : > { %p3193_p1 = pnand %p3191_p0, %p3651_p13  ;;  %p3200_p7 = por %p3199_p4, %p3198_p3 }
  0x28   : > { %p3194_p2 = pneg %p3193_p1 }
  0x2a   : > { %p3201_p8 = pnand %p3200_p7, %p3194_p2 }
  0x2c   : > { %3204 = shalt.err (!%p3201_p8)
}
  0x2d   : > { %s4201_s27 = sld [smem:[#allocation31_spill]]  ;;  %s3216_s30 = scalar_lea.vmem %s3647_s20, 32 }
  0x2e   : > { %p3217_p11 = scmp.ne.s32.totalorder %s3647_s20, %s3216_s30  ;;  %p3224_p9 = scmp.lt.s32.totalorder %s3647_s20, %s3647_s20 }
  0x2f   : > { %p3225_p3 = scmp.lt.s32.totalorder %s3216_s30, %s3216_s30 }
  0x30   : > { %p3219_p0 = pnand %p3217_p11, %p3651_p13 }
  0x31   : > { %p3226_p2 = por %p3225_p3, %p3224_p9 }
  0x32   : > { %p3220_p1 = pneg %p3219_p0 }
  0x33   : > { %2972 = dma.hbm_to_vmem [thread:$0]  (!%p3643_p12), %s4201_s27, 16, %s477_s26, [#allocation6]  }
  0x34   : > { %p3227_p4 = pnand %p3226_p2, %p3220_p1 }
  0x36   : > { %3230 = shalt.err (!%p3227_p4)
}
  0x37   : > { %s4177_s25 = smov 16   ;;  %s4179_s23 = smov 1  }
  0x38   : > { %s4202_s5 = sld [smem:[#allocation32_spill]]  ;;  %s3242_s19 = scalar_lea.vmem %s530_s29, 32 }
  0x39   : > { %p3243_p7 = scmp.ne.s32.totalorder %s530_s29, %s3242_s19  ;;  %p3250_p11 = scmp.lt.s32.totalorder %s530_s29, %s530_s29 }
  0x3a   : > { %p3251_p0 = scmp.lt.s32.totalorder %s3242_s19, %s3242_s19 }
  0x3b   : > { %p3245_p9 = pnand %p3243_p7, %p3651_p13 }
  0x3c   : > { %p3252_p1 = por %p3251_p0, %p3250_p11 }
  0x3d   : > { %p3246_p8 = pneg %p3245_p9 }
  0x3e   : > { %2978 = dma.hbm_to_vmem [thread:$0]  (!%p3643_p12), %s4202_s5, 32, %s3647_s20, [#allocation9], %s4177_s25, %s4177_s25, %s4179_s23  }
  0x3f   : > { %p3253_p3 = pnand %p3252_p1, %p3246_p8 }
  0x41   : > { %3256 = shalt.err (!%p3253_p3)
}
  0x42   : > { %s4203_s8 = sld [smem:[#allocation33_spill]]  ;;  %s3474_s20 = smov [#allocation2]  }
  0x43   : > { %s462_s27 = sshll.u32 %s3474_s20, 4  ;;  %s463_s27 = int_to_ptr.vmem [resolvable:$true] %s462_s27 }
  0x44   : > { %s3268_s26 = scalar_lea.vmem %s463_s27, 256  ;;  %p3276_p9 = scmp.lt.s32.totalorder %s463_s27, %s463_s27 }
  0x45   : > { %p3269_p2 = scmp.ne.s32.totalorder %s463_s27, %s3268_s26  ;;  %p3277_p8 = scmp.lt.s32.totalorder %s3268_s26, %s3268_s26 }
  0x47   : > { %p3271_p4 = pnand %p3269_p2, %p3651_p13  ;;  %p3278_p11 = por %p3277_p8, %p3276_p9 }
  0x48   : > { %2984 = dma.hbm_to_vmem [thread:$0]  (!%p3643_p12), %s4203_s8, 32, %s530_s29, [#allocation12], %s4177_s25, %s4177_s25, %s4179_s23  }
  0x49   : > { %p3272_p7 = pneg %p3271_p4 }
  0x4b   : > { %p3279_p0 = pnand %p3278_p11, %p3272_p7 }
  0x4d   : > { %3282 = shalt.err (!%p3279_p0)
}
  0x4e   : > { %s3475_s19 = smov 128   ;;  %s3476_s5 = smov 8  }
  0x4f   : > { %s4204_s22 = sld [smem:[#allocation30_spill]]  ;;  %s3477_s20 = smov [#allocation7]  }
  0x50   : > { %s487_s25 = sshll.u32 %s3477_s20, 4  ;;  %s3478_s23 = smov [#allocation10]   ;;  %s488_s25 = int_to_ptr.vmem [resolvable:$true] %s487_s25 }
  0x51   : > { %s516_s8 = sshll.u32 %s3478_s23, 4  ;;  %s3294_s18 = scalar_lea.vmem %s488_s25, 16  ;;  %s517_s8 = int_to_ptr.vmem [resolvable:$true] %s516_s8 }
  0x52   : > { %p3295_p1 = scmp.ne.s32.totalorder %s488_s25, %s3294_s18  ;;  %s3301_s26 = scalar_lea.vmem %s488_s25, 32 }
  0x53   : > { %p3302_p4 = scmp.lt.s32.totalorder %s488_s25, %s488_s25  ;;  %p3303_p7 = scmp.lt.s32.totalorder %s3301_s26, %s3294_s18 }
  0x54   : > { %p3297_p3 = pnand %p3295_p1, %p3651_p13 }
  0x55   : > { %2969 = dma.hbm_to_vmem [thread:$0]  (!%p3643_p12), %s4204_s22, 256, %s463_s27, [#allocation3], %s3475_s19, %s3475_s19, %s3476_s5  }
  0x56   : > { %p3298_p2 = pneg %p3297_p3  ;;  %p3304_p9 = por %p3303_p7, %p3302_p4 }
  0x58   : > { %p3305_p8 = pnand %p3304_p9, %p3298_p2 }
  0x5a   : > { %3308 = shalt.err (!%p3305_p8)
}
  0x5b   : > { %2975 = dma.hbm_to_vmem [thread:$0]  (!%p3643_p12), %s4154_s3, 16, %s488_s25, [#allocation6]  }
  0x5c   : > { %s3320_s23 = scalar_lea.vmem %s517_s8, 32  ;;  %p3328_p1 = scmp.lt.s32.totalorder %s517_s8, %s517_s8 }
  0x5d   : > { %p3321_p11 = scmp.ne.s32.totalorder %s517_s8, %s3320_s23  ;;  %p3329_p3 = scmp.lt.s32.totalorder %s3320_s23, %s3320_s23 }
  0x5f   : > { %p3323_p0 = pnand %p3321_p11, %p3651_p13  ;;  %p3330_p5 = por %p3329_p3, %p3328_p1 }
  0x61   : > { %p3324_p6 = pneg %p3323_p0 }
  0x63   : > { %p3331_p10 = pnand %p3330_p5, %p3324_p6 }
  0x65   : > { %3334 = shalt.err (!%p3331_p10)
}
  0x66   : > { %s4205_s18 = smov 1   ;;  %s4206_s19 = smov 16  }
  0x67   : > { %2981 = dma.hbm_to_vmem [thread:$0]  (!%p3643_p12), %s4158_s7, 32, %s517_s8, [#allocation9], %s4206_s19, %s4206_s19, %s4205_s18  }
  0x68   : > { %s3479_s25 = smov [#allocation13]   ;;  %s3480_s20 = smov [#allocation14]  }
  0x69   : > { %s542_s22 = sshll.u32 %s3479_s25, 4  ;;  %s555_s26 = sshll.u32 %s3480_s20, 4  ;;  %s543_s22 = int_to_ptr.vmem [resolvable:$true] %s542_s22  ;;  %s556_s26 = int_to_ptr.vmem [resolvable:$true] %s555_s26 }
  0x6a   : > { %s3346_s5 = scalar_lea.vmem %s543_s22, 32  ;;  %p3354_p10 = scmp.lt.s32.totalorder %s543_s22, %s543_s22 }
  0x6b   : > { %p3347_p2 = scmp.ne.s32.totalorder %s543_s22, %s3346_s5  ;;  %p3355_p4 = scmp.lt.s32.totalorder %s3346_s5, %s3346_s5 }
  0x6d   : > { %p3349_p5 = pnand %p3347_p2, %p3651_p13  ;;  %p3356_p7 = por %p3355_p4, %p3354_p10 }
  0x6f   : > { %p3350_p6 = pneg %p3349_p5 }
  0x71   : > { %p3357_p9 = pnand %p3356_p7, %p3350_p6 }
  0x73   : > { %3360 = shalt.err (!%p3357_p9)
}
  0x74   : > { %2987 = dma.hbm_to_vmem [thread:$0]  (!%p3643_p12), %s4160_s9, 32, %s543_s22, [#allocation12], %s4206_s19, %s4206_s19, %s4205_s18  }
  0x75   : > { %s3372_s23 = scalar_lea.vmem %s556_s26, 512  ;;  %p3380_p1 = scmp.lt.s32.totalorder %s556_s26, %s556_s26 }
  0x76   : > { %p3373_p8 = scmp.ne.s32.totalorder %s556_s26, %s3372_s23  ;;  %p3381_p3 = scmp.lt.s32.totalorder %s3372_s23, %s3372_s23 }
  0x78   : > { %p3375_p11 = pnand %p3373_p8, %p3651_p13  ;;  %p3382_p2 = por %p3381_p3, %p3380_p1 }
  0x7a   : > { %p3376_p0 = pneg %p3375_p11 }
  0x7c   : > { %p3383_p5 = pnand %p3382_p2, %p3376_p0 }
  0x7e   : > { %3386 = shalt.err (!%p3383_p5)
}
  0x7f   : > { %s3481_s30 = smov 64   ;;  %s3482_s29 = smov 4  }
  0x80   : > { %2990 = dma.hbm_to_vmem [thread:$0]  (!%p3643_p12), %s4161_s10, 512, %s556_s26, [#allocation15], %s3481_s30, %s3481_s30, %s3482_s29  }
  0x81   : > { %p4207_p6 = scmp.ne.s32.totalorder %s4198_s24, 0 }
  0x82   : > { %p4208_p10 = scmp.eq.s32.totalorder (!%p4207_p6), %s3607_s0, 0 }
  0x83   : > { %601 = sbr.rel (%p4207_p6) target bundleno = 5294 (0x14ae), region = 92 }
  0x88   : > { %3430 = dma.done.wait (%p4208_p10), [#allocation3], 256   ;;  %p4209_p13 = pmov %p4208_p10 }
  0x89   : > { %p4210_p4 = pmov %p4208_p10 }
  0x8a   : > { %3432 = vsyncadd (%p4209_p13), [#allocation3], 4294967040 }
  0x8b   : > { %3434 = dma.done.wait (%p4210_p4), [#allocation6], 32   ;;  %p4211_p7 = pmov %p4210_p4 }
  0x8c   : > { %p4212_p9 = pmov %p4210_p4 }
  0x8d   : > { %3436 = vsyncadd (%p4211_p7), [#allocation6], 4294967264 }
  0x8e   : > { %3438 = dma.done.wait (%p4212_p9), [#allocation9], 64   ;;  %p4213_p12 = pmov %p4210_p4 }
  0x8f   : > { %p4214_p8 = pmov %p4210_p4 }
  0x90   : > { %3440 = vsyncadd (%p4213_p12), [#allocation9], 4294967232 }
  0x91   : > { %3442 = dma.done.wait (%p4214_p8), [#allocation12], 64   ;;  %p4215_p11 = pmov %p4210_p4 }
  0x92   : > { %p4216_p0 = pmov %p4210_p4 }
  0x93   : > { %3444 = vsyncadd (%p4215_p11), [#allocation12], 4294967232 }
  0x94   : > { %3446 = dma.done.wait (%p4216_p0), [#allocation15], 512   ;;  %p4217_p1 = pmov %p4216_p0 }
  0x95   : > { %s2595_s1 = sshll.u32 %s3607_s0, 1  ;;  %s4218_s19 = sld [smem:[#allocation29_spill]]  ;;  %v717_v1 = vld [vmem:[#allocation2] sm:$0xff]  ;;  %vm723_vm0 = vcmask 261120   ;;  %v718_v4 = vld [vmem:[#allocation2 + $0x8] sm:$0xff]  ;;  %v3483_v19 = vmov 0.0   ;;  %v691_v38 = vlaneseq }
  0x96   : > { %3448 = vsyncadd (%p4217_p1), [#allocation15], 4294966784  ;;  %p684_p3 = scmp.lt.s32.totalorder %s2595_s1, 3  ;;  %v3065_v18 = vld [vmem:[%s4155_s4 + $0x8] sm:$0xff]   ;;  %2784 = vmatprep.subr.bf16.mxu0 %v3483_v19  ;;  %vm3484_vm1 = vmmov 0   ;;  %v3066_v20 = vld [vmem:[%s4155_s4] sm:$0xff]  }
  0x97   : > { %2788 = vmatprep.mubr.msk.bf16.mxu0 %vm3484_vm1, %v3483_v19  ;;  %2785 = vmatpush3.bf16.msra.mxu0 %v3065_v18  ;;  %v2601_v29 = vld [vmem:[#allocation5] ss:$0 sm:$0xff]  ;;  %v2602_v33 = vld [vmem:[#allocation7] ss:$0 sm:$0xff]  ;;  %v692_v39 = vand.u32 127, %v691_v38  ;;  %s3485_s23 = smov 96  }
  0x98   : > { %s4232_s1 = smov (!%p684_p3, %s2595_s1), 3  ;;  %2786 = vmatprep.subr.bf16.mxu0 %v3483_v19  ;;  %v2603_v40 = vld [vmem:[#allocation8] ss:$0 sm:$0xff]  ;;  %v3486_v61 = vmov -1e+30   ;;  %vm982_vm13 = vcmask 130048  }
  0x99   : > { %s2596_s24 = sshll.u32 %s4232_s1, 3  ;;  %vm694_vm2 = vcmp.lt.s32.totalorder %v692_v39, 8  ;;  %vm698_vm3 = vcmp.ge.s32.totalorder %v692_v39, 8  ;;  %vm699_vm4 = vcmp.lt.s32.totalorder %v692_v39, 16  ;;  %vm703_vm6 = vcmp.ge.s32.totalorder %v692_v39, 16  ;;  %s3487_s30 = smov 64  }
  0x9a   : > { %v3776_v42 = vsel %vm694_vm2, 1.0, %v3483_v19  ;;  %vm700_vm5 = vmand %vm698_vm3, %vm699_vm4  ;;  %vm704_vm7 = vcmp.lt.s32.totalorder %v692_v39, 24  ;;  %vm708_vm9 = vcmp.ge.s32.totalorder %v692_v39, 24  ;;  %vm709_vm10 = vcmp.lt.s32.totalorder %v692_v39, 32  ;;  %s680_s21 = sand.u32 1, %s3459_s28   ;;  %s4219_s27 = sld [smem:[#allocation34_spill]] }
  0x9b   : > { %s687_s22 = scalar_lea.vmem %s4218_s19, %s2596_s24  ;;  %2787 = vmatpush3.bf16.msra.mxu0 %v3066_v20  ;;  %v3793_v51 = vsel %vm700_vm5, 1.0, %v3483_v19  ;;  %vm705_vm8 = vmand %vm703_vm6, %vm704_vm7  ;;  %vm713_vm12 = vcmp.lt.s32.totalorder %v692_v39, 9  ;;  %vm1462_vm14 = vcmask 523264   ;;  %s2594_s18 = sshll.u32 %s680_s21, 4 }
  0x9c   : > { %v715_v0 = vld [vmem:[%s687_s22] sm:$0xff]  ;;  %v716_v2 = vld [vmem:[%s687_s22 + $0x8] sm:$0xff]  ;;  %v3803_v54 = vsel %vm705_vm8, 1.0, %v3483_v19  ;;  %vm710_vm11 = vmand %vm708_vm9, %vm709_vm10  ;;  %v3826_v62 = vsel %vm713_vm12, 0.0, %v3486_v61  ;;  %s682_s26 = scalar_lea.vmem [#allocation16], %s2594_s18  ;;  %s4111_s20 = scalar_lea.sflag [#allocation4], %s680_s21 }
  0x9d   : > { %v719_v3 = vadd.f32 %v717_v1, %v715_v0  ;;  %v720_v5 = vadd.f32 %v718_v4, %v716_v2  ;;  %v3812_v57 = vsel %vm710_vm11, 1.0, %v3483_v19  ;;  %s2433_s5 = sshll.u32 %s682_s26, 4  ;;  %p4221_p5 = scmp.ne.s32.totalorder %s4195_s2, 0  ;;  %s4104_s5 = int_to_ptr.vmem [resolvable:$true] %s2433_s5 }
  0x9e   : > { %s3387_s1 = scalar_lea.vmem %s4104_s5, 256 }
  0x9f   : > { %v724_v6 = vsel %vm723_vm0, %v719_v3, 0.0  ;;  %v727_v7 = vsel %vm723_vm0, %v720_v5, 0.0  ;;  %p3388_p2 = scmp.ne.s32.totalorder %s4104_s5, %s3387_s1 }
  0xa0   : > { %725 = vadd.xlane.f32.xlu0 %v724_v6  ;;  %s4220_s25 = smov %s4219_s27 }
  0xa1   : > { %p3389_p6 = pnand %p3388_p2, %p4221_p5 }
  0xa3   : > { %p3390_p10 = pneg %p3389_p6 }
  0xa4   : > { %728 = vadd.xlane.f32.xlu0 %v727_v7 }
 0x129   : > { %v726_v8 = vpop.xlane.xlu0 %725 }
 0x12a   : > { %v731_v9 = vmul.f32 0.03125, %v726_v8 }
 0x12c   : > { %v733_v10 = vsub.f32 %v719_v3, %v731_v9 }
 0x12d   : > { %v729_v11 = vpop.xlane.xlu0 %728 }
 0x12e   : > { %v732_v12 = vmul.f32 0.03125, %v729_v11  ;;  %v735_v13 = vmul.f32 %v733_v10, %v733_v10 }
 0x130   : > { %v734_v14 = vsub.f32 %v720_v5, %v732_v12  ;;  %v737_v15 = vsel %vm723_vm0, %v735_v13, 0.0 }
 0x131   : > { %738 = vadd.xlane.f32.xlu1 %v737_v15 }
 0x132   : > { %v736_v16 = vmul.f32 %v734_v14, %v734_v14 }
 0x134   : > { %v740_v17 = vsel %vm723_vm0, %v736_v16, 0.0 }
 0x135   : > { %741 = vadd.xlane.f32.xlu1 %v740_v17 }
 0x1ba   : > { %v739_v21 = vpop.xlane.xlu1 %738 }
 0x1bb   : > { %v743_v22 = vmul.f32 0.03125, %v739_v21 }
 0x1bd   : > { %v745_v23 = vadd.f32 1e-12, %v743_v22 }
 0x1be   : > { %v742_v24 = vpop.xlane.xlu1 %741 }
 0x1bf   : > { %3087 = vrsqrt.f32 %v745_v23  ;;  %v744_v25 = vmul.f32 0.03125, %v742_v24 }
 0x1c1   : > { %v746_v26 = vadd.f32 1e-12, %v744_v25 }
 0x1c3   : > { %3089 = vrsqrt.f32 %v746_v26 }
 0x1cc   : > { %v3088_v27 = vpop.eup %3087 }
 0x1cd   : > { %v749_v28 = vmul.f32 %v3088_v27, %v733_v10 }
 0x1cf   : > { %v757_v32 = vmul.f32 %v2601_v29, %v749_v28 }
 0x1d0   : > { %v3090_v30 = vpop.eup %3089 }
 0x1d1   : > { %v750_v31 = vmul.f32 %v3090_v30, %v734_v14  ;;  %v3768_v35 = vadd.f32 %v2602_v33, %v757_v32 }
 0x1d3   : > { %v758_v34 = vmul.f32 %v2601_v29, %v750_v31 }
 0x1d5   : > { %v3770_v36 = vadd.f32 %v2602_v33, %v758_v34 }
 0x1d7   : > { %v767_v37 = vpack.c.bf16 %v3770_v36, %v3768_v35 }
 0x1d9   : > { %2789 = vmatmul.mubr.msk.bf16.vlgmr.msra.gmra.mxu0 %vm723_vm0, %v767_v37 }
 0x299   : > { %v828_v41 = vpop.f32.mrf.mxu0 }
 0x29a   : > { %v3778_v43 = vadd.f32 %v2603_v40, %v828_v41 }
 0x29b   : > { %v2790_v44 = vpop.f32.mrf.mxu0 }
 0x29c   : > { %845 = vrot.lane.b32.xlu1 %v3778_v43, %s3485_s23  ;;  %v835_v45 = vmul.f32 %v3776_v42, %v3778_v43  ;;  %v837_v53 = vmul.f32 %v3793_v51, %v3778_v43  ;;  %v839_v56 = vmul.f32 %v3803_v54, %v3778_v43  ;;  %v841_v59 = vmul.f32 %v3812_v57, %v3778_v43 }
 0x29d   : > { %v831_v46 = vpop.f32.mrf.mxu0 }
 0x29e   : > { %v3784_v47 = vadd.f32 %v2603_v40, %v831_v46  ;;  %2796 = vmatprep.mubr.msk.f32.mxu1 %vm723_vm0, %v835_v45 }
 0x29f   : > { %v2791_v48 = vpop.f32.mrf.mxu0 }
 0x2a0   : > { %847 = vrot.lane.b32.xlu0 %v3784_v47, %s3485_s23  ;;  %v836_v52 = vmul.f32 %v3776_v42, %v3784_v47  ;;  %v838_v55 = vmul.f32 %v3793_v51, %v3784_v47  ;;  %v840_v58 = vmul.f32 %v3803_v54, %v3784_v47  ;;  %v842_v60 = vmul.f32 %v3812_v57, %v3784_v47 }
 0x30e   : > { %v846_v50 = vpop.permute.xlu1 %845 }
 0x312   : > { %v848_v49 = vpop.permute.xlu0 %847 }
 0x313   : > { %2792 = vmatprep.subr.msk.mxu1 %vm723_vm0, %v848_v49 }
 0x314   : > { %2793 = vmatpush3.xpose.msk.msra.mxu1 %vm723_vm0, %v848_v49 }
 0x315   : > { %2794 = vmatprep.subr.msk.mxu1 %vm723_vm0, %v846_v50 }
 0x318   : > { %2795 = vmatpush3.xpose.msk.msra.mxu1 %vm723_vm0, %v846_v50 }
 0x319   : > { %2824 = vmatprep.subr.bf16.mxu1 %v3483_v19 }
 0x31b   : > { %2797 = vmatmul.mubr.msk.f32.vlgmr.msra.gmra.mxu1 %vm723_vm0, %v836_v52 }
 0x31c   : > { %2799 = vmatprep.mubr.msk.f32.mxu1 %vm723_vm0, %v837_v53 }
 0x31f   : > { %2800 = vmatmul.mubr.msk.f32.gmra.mxu1 %vm723_vm0, %v838_v55 }
 0x320   : > { %2802 = vmatprep.mubr.msk.f32.mxu1 %vm723_vm0, %v839_v56 }
 0x323   : > { %2803 = vmatmul.mubr.msk.f32.gmra.mxu1 %vm723_vm0, %v840_v58 }
 0x324   : > { %2805 = vmatprep.mubr.msk.f32.mxu1 %vm723_vm0, %v841_v59 }
 0x327   : > { %2806 = vmatmul.mubr.msk.f32.gmra.mxu1 %vm723_vm0, %v842_v60 }
 0x328   : > { %2828 = vmatprep.mubr.msk.bf16.mxu1 %vm3484_vm1, %v3483_v19 }
 0x3db   : > { %v2798_v63 = vpop.f32.mrf.mxu1 }
 0x3dc   : > { %v949_v0 = vadd.f32 %v2798_v63, %v3826_v62 }
 0x3dd   : > { %v943_v1 = vpop.f32.mrf.mxu1 }
 0x3de   : > { %v944_v2 = vadd.f32 %v943_v1, %v3826_v62  ;;  %v986_v3 = vsel %vm982_vm13, %v949_v0, -inf }
 0x3df   : > { %987 = vmax.xlane.f32.xlu0 %v986_v3  ;;  %v2801_v4 = vpop.f32.mrf.mxu1 }
 0x3e0   : > { %v959_v5 = vadd.f32 %v2801_v4, %v3826_v62  ;;  %v983_v6 = vsel %vm982_vm13, %v944_v2, -inf }
 0x3e1   : > { %v953_v7 = vpop.f32.mrf.mxu1  ;;  %984 = vmax.xlane.f32.xlu1 %v983_v6 }
 0x3e2   : > { %v954_v8 = vadd.f32 %v953_v7, %v3826_v62  ;;  %v992_v12 = vsel %vm982_vm13, %v959_v5, -inf }
 0x3e3   : > { %v2804_v9 = vpop.f32.mrf.mxu1 }
 0x3e4   : > { %v969_v10 = vadd.f32 %v2804_v9, %v3826_v62  ;;  %v989_v11 = vsel %vm982_vm13, %v954_v8, -inf }
 0x3e5   : > { %v963_v13 = vpop.f32.mrf.mxu1  ;;  %990 = vmax.xlane.f32.xlu0 %v989_v11  ;;  %993 = vmax.xlane.f32.xlu1 %v992_v12 }
 0x3e6   : > { %v964_v14 = vadd.f32 %v963_v13, %v3826_v62  ;;  %v998_v18 = vsel %vm982_vm13, %v969_v10, -inf }
 0x3e7   : > { %v2807_v15 = vpop.f32.mrf.mxu1 }
 0x3e8   : > { %v979_v16 = vadd.f32 %v2807_v15, %v3826_v62  ;;  %v995_v17 = vsel %vm982_vm13, %v964_v14, -inf }
 0x3e9   : > { %v973_v20 = vpop.f32.mrf.mxu1  ;;  %996 = vmax.xlane.f32.xlu0 %v995_v17  ;;  %999 = vmax.xlane.f32.xlu1 %v998_v18 }
 0x3ea   : > { %v974_v21 = vadd.f32 %v973_v20, %v3826_v62  ;;  %v1004_v23 = vsel %vm982_vm13, %v979_v16, -inf }
 0x3ec   : > { %v1001_v22 = vsel %vm982_vm13, %v974_v21, -inf }
 0x3ed   : > { %1002 = vmax.xlane.f32.xlu0 %v1001_v22  ;;  %1005 = vmax.xlane.f32.xlu1 %v1004_v23 }
 0x468   : > { %v988_v24 = vpop.xlane.xlu0 %987 }
 0x469   : > { %v1008_v25 = vsub.f32 %v949_v0, %v988_v24 }
 0x46a   : > { %v985_v26 = vpop.xlane.xlu1 %984 }
 0x46b   : > { %v1017_v27 = vmul.f32 1.442695, %v1008_v25  ;;  %v1007_v28 = vsub.f32 %v944_v2, %v985_v26 }
 0x46d   : > { %3091 = vpow2.f32 %v1017_v27  ;;  %v1015_v29 = vmul.f32 1.442695, %v1007_v28 }
 0x46e   : > { %v991_v30 = vpop.xlane.xlu0 %990  ;;  %v994_v31 = vpop.xlane.xlu1 %993 }
 0x46f   : > { %3093 = vpow2.f32 %v1015_v29  ;;  %v1009_v32 = vsub.f32 %v954_v8, %v991_v30  ;;  %v1010_v33 = vsub.f32 %v959_v5, %v994_v31 }
 0x471   : > { %v1019_v34 = vmul.f32 1.442695, %v1009_v32  ;;  %v1021_v37 = vmul.f32 1.442695, %v1010_v33 }
 0x472   : > { %v997_v38 = vpop.xlane.xlu0 %996  ;;  %v1000_v39 = vpop.xlane.xlu1 %999 }
 0x473   : > { %3095 = vpow2.f32 %v1019_v34  ;;  %v1011_v40 = vsub.f32 %v964_v14, %v997_v38  ;;  %v1012_v41 = vsub.f32 %v969_v10, %v1000_v39  ;;  %v3067_v34 = vld [vmem:[%s4157_s6 + $0x8] sm:$0xff]  }
 0x474   : > { %3097 = vpow2.f32 %v1021_v37  ;;  %2825 = vmatpush3.bf16.msra.mxu1 %v3067_v34  ;;  %v3068_v37 = vld [vmem:[%s4157_s6] sm:$0xff]  }
 0x475   : > { %v1023_v44 = vmul.f32 1.442695, %v1011_v40  ;;  %v1025_v45 = vmul.f32 1.442695, %v1012_v41  ;;  %2826 = vmatprep.subr.bf16.mxu1 %v3483_v19 }
 0x476   : > { %v1003_v46 = vpop.xlane.xlu0 %1002  ;;  %v1006_v48 = vpop.xlane.xlu1 %1005 }
 0x477   : > { %3099 = vpow2.f32 %v1023_v44  ;;  %v1013_v49 = vsub.f32 %v974_v21, %v1003_v46  ;;  %v1014_v50 = vsub.f32 %v979_v16, %v1006_v48 }
 0x478   : > { %3101 = vpow2.f32 %v1025_v45  ;;  %2827 = vmatpush3.bf16.msra.mxu1 %v3068_v37 }
 0x479   : > { %v1027_v52 = vmul.f32 1.442695, %v1013_v49  ;;  %v1029_v53 = vmul.f32 1.442695, %v1014_v50  ;;  %2840 = vmatprep.subr.bf16.mxu1 %v3483_v19 }
 0x47a   : > { %v3092_v55 = vpop.eup %3091 }
 0x47b   : > { %3103 = vpow2.f32 %v1027_v52  ;;  %v1034_v56 = vsel %vm982_vm13, %v3092_v55, 0.0 }
 0x47c   : > { %v3094_v58 = vpop.eup %3093  ;;  %3105 = vpow2.f32 %v1029_v53  ;;  %1035 = vadd.xlane.f32.xlu1 %v1034_v56 }
 0x47d   : > { %v1031_v59 = vsel %vm982_vm13, %v3094_v58, 0.0 }
 0x47e   : > { %1032 = vadd.xlane.f32.xlu0 %v1031_v59 }
 0x480   : > { %v3096_v60 = vpop.eup %3095 }
 0x481   : > { %v3098_v61 = vpop.eup %3097  ;;  %v1037_v63 = vsel %vm982_vm13, %v3096_v60, 0.0 }
 0x482   : > { %1038 = vadd.xlane.f32.xlu0 %v1037_v63  ;;  %v1040_v0 = vsel %vm982_vm13, %v3098_v61, 0.0 }
 0x483   : > { %1041 = vadd.xlane.f32.xlu1 %v1040_v0 }
 0x484   : > { %v3100_v1 = vpop.eup %3099 }
 0x485   : > { %v3102_v2 = vpop.eup %3101  ;;  %v1043_v3 = vsel %vm982_vm13, %v3100_v1, 0.0 }
 0x486   : > { %1044 = vadd.xlane.f32.xlu0 %v1043_v3  ;;  %v1046_v4 = vsel %vm982_vm13, %v3102_v2, 0.0 }
 0x487   : > { %1047 = vadd.xlane.f32.xlu1 %v1046_v4  ;;  %v2625_v4 = vld [vmem:[#allocation10] ss:$0 sm:$0xff] }
 0x488   : > { %v3104_v5 = vpop.eup %3103 }
 0x489   : > { %v3106_v6 = vpop.eup %3105  ;;  %v1049_v7 = vsel %vm982_vm13, %v3104_v5, 0.0 }
 0x48a   : > { %1050 = vadd.xlane.f32.xlu0 %v1049_v7  ;;  %v1052_v8 = vsel %vm982_vm13, %v3106_v6, 0.0 }
 0x48b   : > { %1053 = vadd.xlane.f32.xlu1 %v1052_v8 }
 0x49c   : > { %1071 = vrot.lane.b32.xlu1 %v3778_v43, %s3487_s30 }
 0x4a0   : > { %1073 = vrot.lane.b32.xlu0 %v3784_v47, %s3487_s30 }
 0x505   : > { %v1036_v9 = vpop.xlane.xlu1 %1035 }
 0x507   : > { %v1033_v10 = vpop.xlane.xlu0 %1032 }
 0x508   : > { %3107 = vrcp.f32 %v1033_v10 }
 0x509   : > { %3109 = vrcp.f32 %v1036_v9 }
 0x50b   : > { %v1039_v11 = vpop.xlane.xlu0 %1038 }
 0x50c   : > { %3111 = vrcp.f32 %v1039_v11  ;;  %v1042_v12 = vpop.xlane.xlu1 %1041 }
 0x50d   : > { %3113 = vrcp.f32 %v1042_v12 }
 0x50f   : > { %v1045_v13 = vpop.xlane.xlu0 %1044 }
 0x510   : > { %3115 = vrcp.f32 %v1045_v13  ;;  %v1048_v14 = vpop.xlane.xlu1 %1047 }
 0x511   : > { %3117 = vrcp.f32 %v1048_v14 }
 0x513   : > { %v1051_v15 = vpop.xlane.xlu0 %1050 }
 0x514   : > { %3119 = vrcp.f32 %v1051_v15  ;;  %v1054_v16 = vpop.xlane.xlu1 %1053 }
 0x515   : > { %v3108_v17 = vpop.eup %3107  ;;  %3121 = vrcp.f32 %v1054_v16 }
 0x516   : > { %v1063_v43 = vmul.f32 %v3108_v17, %v3094_v58  ;;  %v3110_v18 = vpop.eup %3109 }
 0x517   : > { %v1074_v47 = vpop.permute.xlu0 %1073  ;;  %v1064_v22 = vmul.f32 %v3110_v18, %v3092_v55 }
 0x518   : > { %2808 = vmatprep.subr.mxu0 %v1074_v47  ;;  %2812 = vmatprep.mubr.msk.f32.mxu0 %vm982_vm13, %v1063_v43  ;;  %v1072_v21 = vpop.permute.xlu1 %1071 }
 0x519   : > { %v3112_v20 = vpop.eup %3111  ;;  %2809 = vmatpush3.msra.mxu0 %v1074_v47 }
 0x51a   : > { %2810 = vmatprep.subr.mxu0 %v1072_v21  ;;  %v1065_v23 = vmul.f32 %v3112_v20, %v3096_v60  ;;  %v3114_v24 = vpop.eup %3113 }
 0x51b   : > { %2811 = vmatpush3.msra.mxu0 %v1072_v21  ;;  %v1066_v26 = vmul.f32 %v3114_v24, %v3098_v61 }
 0x51c   : > { %2813 = vmatmul.mubr.msk.f32.vlgmr.msra.gmra.mxu0 %vm982_vm13, %v1064_v22  ;;  %2832 = vmatprep.subr.bf16.mxu0 %v3483_v19 }
 0x51d   : > { %v3116_v25 = vpop.eup %3115  ;;  %2815 = vmatprep.mubr.msk.f32.mxu0 %vm982_vm13, %v1065_v23  ;;  %v3069_v23 = vld [vmem:[#allocation14 + $0x8] sm:$0xff]  }
 0x51e   : > { %v1067_v27 = vmul.f32 %v3116_v25, %v3100_v1  ;;  %v3118_v28 = vpop.eup %3117  ;;  %2833 = vmatpush3.bf16.msra.mxu0 %v3069_v23 }
 0x51f   : > { %v1068_v30 = vmul.f32 %v3118_v28, %v3102_v2  ;;  %2834 = vmatprep.subr.bf16.mxu0 %v3483_v19 }
 0x520   : > { %2816 = vmatmul.mubr.msk.f32.gmra.mxu0 %vm982_vm13, %v1066_v26 }
 0x521   : > { %v3120_v29 = vpop.eup %3119  ;;  %2818 = vmatprep.mubr.msk.f32.mxu0 %vm982_vm13, %v1067_v27 }
 0x522   : > { %v1069_v31 = vmul.f32 %v3120_v29, %v3104_v5  ;;  %v3122_v32 = vpop.eup %3121 }
 0x523   : > { %v1070_v33 = vmul.f32 %v3122_v32, %v3106_v6  ;;  %v2629_v32 = vld [vmem:[#allocation11] ss:$0 sm:$0xff] }
 0x524   : > { %2819 = vmatmul.mubr.msk.f32.gmra.mxu0 %vm982_vm13, %v1068_v30 }
 0x525   : > { %2821 = vmatprep.mubr.msk.f32.mxu0 %vm982_vm13, %v1069_v31 }
 0x528   : > { %2822 = vmatmul.mubr.msk.f32.gmra.mxu0 %vm982_vm13, %v1070_v33 }
 0x529   : > { %2836 = vmatprep.mubr.msk.bf16.mxu0 %vm3484_vm1, %v3483_v19 }
 0x5dc   : > { %v2814_v38 = vpop.f32.mrf.mxu0 }
 0x5dd   : > { %v1207_v49 = vmul.f32 %v2814_v38, %v3776_v42  ;;  %v2630_v38 = vld [vmem:[#allocation13] ss:$0 sm:$0xff] }
 0x5de   : > { %v1167_v39 = vpop.f32.mrf.mxu0 }
 0x5df   : > { %v1206_v50 = vmul.f32 %v3776_v42, %v1167_v39 }
 0x5e0   : > { %v2817_v40 = vpop.f32.mrf.mxu0 }
 0x5e1   : > { %v1211_v45 = vmul.f32 %v2817_v40, %v3793_v51 }
 0x5e2   : > { %v1177_v41 = vpop.f32.mrf.mxu0 }
 0x5e3   : > { %v1210_v46 = vmul.f32 %v3793_v51, %v1177_v41  ;;  %v1213_v56 = vadd.f32 %v1211_v45, %v1207_v49  ;;  %v3071_v45 = vld [vmem:[%s4163_s12 + $0x18] sm:$0xff]   ;;  %v3074_v49 = vld [vmem:[%s4163_s12] sm:$0xff]  }
 0x5e4   : > { %v2820_v44 = vpop.f32.mrf.mxu0 }
 0x5e5   : > { %v1215_v52 = vmul.f32 %v2820_v44, %v3803_v54  ;;  %v1212_v58 = vadd.f32 %v1210_v46, %v1206_v50  ;;  %v3072_v46 = vld [vmem:[%s4163_s12 + $0x10] sm:$0xff]   ;;  %v2631_v50 = vld [vmem:[%s4162_s11] ss:$0 sm:$0xff] }
 0x5e6   : > { %v1187_v48 = vpop.f32.mrf.mxu0 }
 0x5e7   : > { %v1214_v53 = vmul.f32 %v3803_v54, %v1187_v48  ;;  %v1217_v61 = vadd.f32 %v1215_v52, %v1213_v56  ;;  %v3073_v48 = vld [vmem:[%s4163_s12 + $0x8] sm:$0xff]  }
 0x5e8   : > { %v2823_v55 = vpop.f32.mrf.mxu0 }
 0x5e9   : > { %v1219_v59 = vmul.f32 %v2823_v55, %v3812_v57  ;;  %v1216_v63 = vadd.f32 %v1214_v53, %v1212_v58 }
 0x5ea   : > { %v1197_v60 = vpop.f32.mrf.mxu0 }
 0x5eb   : > { %v1218_v0 = vmul.f32 %v3812_v57, %v1197_v60  ;;  %v1221_v1 = vadd.f32 %v1219_v59, %v1217_v61 }
 0x5ed   : > { %v1220_v2 = vadd.f32 %v1218_v0, %v1216_v63 }
 0x5ef   : > { %v1222_v3 = vpack.c.bf16 %v1221_v1, %v1220_v2 }
 0x5f1   : > { %2829 = vmatmul.mubr.msk.bf16.vlgmr.msra.gmra.mxu1 %vm723_vm0, %v1222_v3 }
 0x5f2   : > { %2848 = vmatprep.mubr.msk.bf16.mxu1 %vm3484_vm1, %v3483_v19  ;;  %2841 = vmatpush3.bf16.msra.mxu1 %v3071_v45 }
 0x5f3   : > { %2842 = vmatprep.subr.bf16.mxu1 %v3483_v19 }
 0x5f6   : > { %2843 = vmatpush3.bf16.msra.mxu1 %v3072_v46 }
 0x5f7   : > { %2844 = vmatprep.subr.bf16.mxu1 %v3483_v19 }
 0x5fa   : > { %2845 = vmatpush3.bf16.msra.mxu1 %v3073_v48 }
 0x5fb   : > { %2846 = vmatprep.subr.bf16.mxu1 %v3483_v19 }
 0x5fe   : > { %2847 = vmatpush3.bf16.msra.mxu1 %v3074_v49  ;;  %v2641_v49 = vld [vmem:[%s4165_s14] ss:$0 sm:$0xff] }
 0x6b1   : > { %v1283_v5 = vpop.f32.mrf.mxu1 }
 0x6b2   : > { %v1284_v6 = vadd.f32 %v2625_v4, %v1283_v5 }
 0x6b3   : > { %v2830_v7 = vpop.f32.mrf.mxu1 }
 0x6b4   : > { %v1290_v8 = vadd.f32 %v1284_v6, %v3768_v35 }
 0x6b5   : > { %v1286_v9 = vpop.f32.mrf.mxu1 }
 0x6b6   : > { %v1287_v10 = vadd.f32 %v2625_v4, %v1286_v9  ;;  %v1294_v11 = vsel %vm723_vm0, %v1290_v8, 0.0 }
 0x6b7   : > { %1295 = vadd.xlane.f32.xlu1 %v1294_v11  ;;  %v2831_v12 = vpop.f32.mrf.mxu1 }
 0x6b8   : > { %v1291_v13 = vadd.f32 %v1287_v10, %v3770_v36  ;;  %v3070_v36 = vld [vmem:[#allocation14] sm:$0xff]  }
 0x6b9   : > { %2835 = vmatpush3.bf16.msra.mxu0 %v3070_v36 }
 0x6ba   : > { %v1297_v14 = vsel %vm723_vm0, %v1291_v13, 0.0  ;;  %2852 = vmatprep.subr.bf16.mxu0 %v3483_v19 }
 0x6bb   : > { %1298 = vadd.xlane.f32.xlu0 %v1297_v14 }
 0x740   : > { %v1296_v15 = vpop.xlane.xlu1 %1295 }
 0x741   : > { %v1300_v16 = vmul.f32 0.03125, %v1296_v15 }
 0x743   : > { %v1302_v17 = vsub.f32 %v1290_v8, %v1300_v16  ;;  %v2635_v16 = vld [vmem:[%s4164_s13] ss:$0 sm:$0xff] }
 0x744   : > { %v1299_v43 = vpop.xlane.xlu0 %1298 }
 0x745   : > { %v1301_v18 = vmul.f32 0.03125, %v1299_v43  ;;  %v1304_v47 = vmul.f32 %v1302_v17, %v1302_v17 }
 0x747   : > { %v1303_v20 = vsub.f32 %v1291_v13, %v1301_v18  ;;  %v1306_v35 = vsel %vm723_vm0, %v1304_v47, 0.0 }
 0x748   : > { %1307 = vadd.xlane.f32.xlu0 %v1306_v35 }
 0x749   : > { %v1305_v21 = vmul.f32 %v1303_v20, %v1303_v20 }
 0x74b   : > { %v1309_v22 = vsel %vm723_vm0, %v1305_v21, 0.0 }
 0x74c   : > { %1310 = vadd.xlane.f32.xlu1 %v1309_v22 }
 0x7d1   : > { %v1308_v24 = vpop.xlane.xlu0 %1307 }
 0x7d2   : > { %v1312_v25 = vmul.f32 0.03125, %v1308_v24 }
 0x7d4   : > { %v1314_v26 = vadd.f32 1e-12, %v1312_v25 }
 0x7d5   : > { %v1311_v27 = vpop.xlane.xlu1 %1310 }
 0x7d6   : > { %3123 = vrsqrt.f32 %v1314_v26  ;;  %v1313_v28 = vmul.f32 0.03125, %v1311_v27 }
 0x7d8   : > { %v1315_v29 = vadd.f32 1e-12, %v1313_v28 }
 0x7da   : > { %3125 = vrsqrt.f32 %v1315_v29 }
 0x7e3   : > { %v3124_v30 = vpop.eup %3123 }
 0x7e4   : > { %v1318_v31 = vmul.f32 %v3124_v30, %v1302_v17 }
 0x7e6   : > { %v1326_v34 = vmul.f32 %v2629_v32, %v1318_v31 }
 0x7e7   : > { %v3126_v33 = vpop.eup %3125 }
 0x7e8   : > { %v1319_v37 = vmul.f32 %v3126_v33, %v1303_v20  ;;  %v1334_v40 = vadd.f32 %v2630_v38, %v1326_v34  ;;  %v3075_v34 = vld [vmem:[%s4155_s4 + $0x18] sm:$0xff]  }
 0x7ea   : > { %v1327_v39 = vmul.f32 %v2629_v32, %v1319_v37  ;;  %v3076_v37 = vld [vmem:[%s4155_s4 + $0x10] sm:$0xff]  }
 0x7ec   : > { %v1335_v41 = vadd.f32 %v2630_v38, %v1327_v39 }
 0x7ee   : > { %v1336_v44 = vpack.c.bf16 %v1335_v41, %v1334_v40 }
 0x7f0   : > { %2837 = vmatmul.mubr.msk.bf16.vlgmr.msra.gmra.mxu0 %vm723_vm0, %v1336_v44 }
 0x7f1   : > { %2856 = vmatprep.mubr.msk.bf16.mxu0 %vm3484_vm1, %v3483_v19  ;;  %2853 = vmatpush3.bf16.msra.mxu0 %v3075_v34 }
 0x7f2   : > { %2854 = vmatprep.subr.bf16.mxu0 %v3483_v19 }
 0x7f5   : > { %2855 = vmatpush3.bf16.msra.mxu0 %v3076_v37 }
 0x8b0   : > { %v1397_v52 = vpop.f32.mrf.mxu0 }
 0x8b1   : > { %v1398_v53 = vadd.f32 %v2631_v50, %v1397_v52 }
 0x8b2   : > { %v2838_v55 = vpop.f32.mrf.mxu0 }
 0x8b3   : > { %v1406_v56 = vmul.f32 0.044715, %v1398_v53  ;;  %v1404_v10 = vmul.f32 0.5, %v1398_v53  ;;  %v2642_v55 = vld [vmem:[%s4166_s15] ss:$0 sm:$0xff] }
 0x8b4   : > { %v1400_v58 = vpop.f32.mrf.mxu0 }
 0x8b5   : > { %v1408_v59 = vmul.f32 %v1406_v56, %v1398_v53  ;;  %v1401_v60 = vadd.f32 %v2631_v50, %v1400_v58 }
 0x8b6   : > { %v2839_v61 = vpop.f32.mrf.mxu0 }
 0x8b7   : > { %v1410_v63 = vmul.f32 %v1408_v59, %v1398_v53  ;;  %v1407_v0 = vmul.f32 0.044715, %v1401_v60  ;;  %v1405_v11 = vmul.f32 0.5, %v1401_v60  ;;  %v2647_v61 = vld [vmem:[#allocation8 + $0x1] ss:$0 sm:$0xff] }
 0x8b9   : > { %v1412_v1 = vadd.f32 %v1410_v63, %v1398_v53  ;;  %v1409_v2 = vmul.f32 %v1407_v0, %v1401_v60 }
 0x8bb   : > { %v1414_v3 = vmul.f32 0.7978846, %v1412_v1  ;;  %v1411_v4 = vmul.f32 %v1409_v2, %v1401_v60 }
 0x8bd   : > { %3127 = vtanh.f32 %v1414_v3  ;;  %v1413_v5 = vadd.f32 %v1411_v4, %v1401_v60 }
 0x8bf   : > { %v1415_v6 = vmul.f32 0.7978846, %v1413_v5 }
 0x8c1   : > { %3129 = vtanh.f32 %v1415_v6 }
 0x8ca   : > { %v3128_v7 = vpop.eup %3127 }
 0x8cb   : > { %v1418_v8 = vadd.f32 1.0, %v3128_v7 }
 0x8cd   : > { %v1420_v13 = vmul.f32 %v1418_v8, %v1404_v10 }
 0x8ce   : > { %v3130_v9 = vpop.eup %3129 }
 0x8cf   : > { %v1419_v12 = vadd.f32 1.0, %v3130_v9 }
 0x8d1   : > { %v1421_v14 = vmul.f32 %v1419_v12, %v1405_v11 }
 0x8d3   : > { %v1422_v15 = vpack.c.bf16 %v1421_v14, %v1420_v13 }
 0x8d5   : > { %2849 = vmatmul.mubr.msk.bf16.vlgmr.msra.gmra.mxu1 %vm1462_vm14, %v1422_v15 }
 0x995   : > { %v1500_v17 = vpop.f32.mrf.mxu1 }
 0x996   : > { %v1501_v43 = vadd.f32 %v2635_v16, %v1500_v17 }
 0x997   : > { %v2850_v18 = vpop.f32.mrf.mxu1 }
 0x998   : > { %v1507_v47 = vadd.f32 %v1501_v43, %v1334_v40 }
 0x999   : > { %v1503_v20 = vpop.f32.mrf.mxu1 }
 0x99a   : > { %v1504_v35 = vadd.f32 %v2635_v16, %v1503_v20  ;;  %v1511_v21 = vsel %vm723_vm0, %v1507_v47, 0.0 }
 0x99b   : > { %1512 = vadd.xlane.f32.xlu0 %v1511_v21  ;;  %v2851_v22 = vpop.f32.mrf.mxu1 }
 0x99c   : > { %v1508_v23 = vadd.f32 %v1504_v35, %v1335_v41 }
 0x99e   : > { %v1514_v36 = vsel %vm723_vm0, %v1508_v23, 0.0 }
 0x99f   : > { %1515 = vadd.xlane.f32.xlu1 %v1514_v36 }
 0xa24   : > { %v1513_v24 = vpop.xlane.xlu0 %1512 }
 0xa25   : > { %v1517_v25 = vmul.f32 0.03125, %v1513_v24 }
 0xa27   : > { %v1519_v26 = vsub.f32 %v1507_v47, %v1517_v25 }
 0xa28   : > { %v1516_v27 = vpop.xlane.xlu1 %1515 }
 0xa29   : > { %v1518_v28 = vmul.f32 0.03125, %v1516_v27  ;;  %v1521_v29 = vmul.f32 %v1519_v26, %v1519_v26 }
 0xa2b   : > { %v1520_v30 = vsub.f32 %v1508_v23, %v1518_v28  ;;  %v1523_v31 = vsel %vm723_vm0, %v1521_v29, 0.0 }
 0xa2c   : > { %1524 = vadd.xlane.f32.xlu0 %v1523_v31 }
 0xa2d   : > { %v1522_v32 = vmul.f32 %v1520_v30, %v1520_v30 }
 0xa2f   : > { %v1526_v33 = vsel %vm723_vm0, %v1522_v32, 0.0 }
 0xa30   : > { %1527 = vadd.xlane.f32.xlu1 %v1526_v33 }
 0xab5   : > { %v1525_v38 = vpop.xlane.xlu0 %1524 }
 0xab6   : > { %v1529_v39 = vmul.f32 0.03125, %v1525_v38 }
 0xab8   : > { %v1531_v40 = vadd.f32 1e-12, %v1529_v39 }
 0xab9   : > { %v1528_v41 = vpop.xlane.xlu1 %1527 }
 0xaba   : > { %3131 = vrsqrt.f32 %v1531_v40  ;;  %v1530_v44 = vmul.f32 0.03125, %v1528_v41 }
 0xabc   : > { %v1532_v45 = vadd.f32 1e-12, %v1530_v44 }
 0xabe   : > { %3133 = vrsqrt.f32 %v1532_v45 }
 0xac7   : > { %v3132_v46 = vpop.eup %3131 }
 0xac8   : > { %v1535_v48 = vmul.f32 %v3132_v46, %v1519_v26 }
 0xaca   : > { %v1543_v53 = vmul.f32 %v2641_v49, %v1535_v48 }
 0xacb   : > { %v3134_v50 = vpop.eup %3133 }
 0xacc   : > { %v1536_v52 = vmul.f32 %v3134_v50, %v1520_v30  ;;  %v3936_v58 = vadd.f32 %v2642_v55, %v1543_v53 }
 0xace   : > { %v1544_v56 = vmul.f32 %v2641_v49, %v1536_v52 }
 0xad0   : > { %v3938_v59 = vadd.f32 %v2642_v55, %v1544_v56 }
 0xad2   : > { %v1553_v60 = vpack.c.bf16 %v3938_v59, %v3936_v58 }
 0xad4   : > { %2857 = vmatmul.mubr.msk.bf16.vlgmr.msra.gmra.mxu0 %vm723_vm0, %v1553_v60 }
 0xb94   : > { %v1616_v63 = vpop.f32.mrf.mxu0 }
 0xb95   : > { %v3943_v0 = vadd.f32 %v2647_v61, %v1616_v63 }
 0xb96   : > { %v2858_v1 = vpop.f32.mrf.mxu0 }
 0xb97   : > { %1633 = vrot.lane.b32.xlu1 %v3943_v0, %s3485_s23  ;;  %v1623_v2 = vmul.f32 %v3776_v42, %v3943_v0  ;;  %v1629_v3 = vmul.f32 %v3812_v57, %v3943_v0  ;;  %v1625_v11 = vmul.f32 %v3793_v51, %v3943_v0  ;;  %v1627_v13 = vmul.f32 %v3803_v54, %v3943_v0 }
 0xb98   : > { %v1619_v4 = vpop.f32.mrf.mxu0 }
 0xb99   : > { %v3951_v5 = vadd.f32 %v2647_v61, %v1619_v4  ;;  %2864 = vmatprep.mubr.msk.f32.mxu0 %vm723_vm0, %v1623_v2  ;;  %2873 = vmatprep.mubr.msk.f32.mxu1 %vm723_vm0, %v1629_v3 }
 0xb9a   : > { %v2859_v6 = vpop.f32.mrf.mxu0 }
 0xb9b   : > { %1635 = vrot.lane.b32.xlu0 %v3951_v5, %s3485_s23  ;;  %v1624_v9 = vmul.f32 %v3776_v42, %v3951_v5  ;;  %v1630_v10 = vmul.f32 %v3812_v57, %v3951_v5  ;;  %v1626_v12 = vmul.f32 %v3793_v51, %v3951_v5  ;;  %v1628_v14 = vmul.f32 %v3803_v54, %v3951_v5  ;;  %s2712_s23 = sshll.u32 %s3607_s0, 8  ;;  %s3488_s0 = smov [#allocation16]  }
 0xb9c   : > { %s4109_s29 = scalar_lea.hbm %s4219_s27, %s2712_s23  ;;  %s3391_s24 = sshll.u32 %s3488_s0, 4  ;;  %s3392_s24 = int_to_ptr.vmem [resolvable:$false] %s3391_s24 }
 0xb9d   : > { %s3393_s18 = scalar_lea.vmem %s3392_s24, 512  ;;  %p3394_p13 = scmp.lt.s32.totalorder %s4104_s5, %s3392_s24 }
 0xb9e   : > { %p3395_p4 = scmp.lt.s32.totalorder %s3393_s18, %s3387_s1 }
 0xba0   : > { %p3396_p7 = por %p3395_p4, %p3394_p13 }
 0xba2   : > { %p3397_p9 = pnand %p3396_p7, %p3390_p10 }
 0xc09   : > { %v1634_v8 = vpop.permute.xlu1 %1633 }
 0xc0d   : > { %v1636_v7 = vpop.permute.xlu0 %1635 }
 0xc0e   : > { %2860 = vmatprep.subr.msk.mxu0 %vm723_vm0, %v1636_v7  ;;  %2928 = vmatprep.subr.msk.mxu1 %vm723_vm0, %v1636_v7 }
 0xc0f   : > { %2861 = vmatpush3.xpose.msk.msra.mxu0 %vm723_vm0, %v1636_v7  ;;  %2930 = vmatpush3.xpose.msk.msra.mxu1 %vm723_vm0, %v1636_v7 }
 0xc10   : > { %2862 = vmatprep.subr.msk.mxu0 %vm723_vm0, %v1634_v8  ;;  %2929 = vmatprep.subr.msk.mxu1 %vm723_vm0, %v1634_v8 }
 0xc13   : > { %2863 = vmatpush3.xpose.msk.msra.mxu0 %vm723_vm0, %v1634_v8  ;;  %2931 = vmatpush3.xpose.msk.msra.mxu1 %vm723_vm0, %v1634_v8 }
 0xc14   : > { %2892 = vmatprep.subr.bf16.mxu0 %v3483_v19 }
 0xc16   : > { %2865 = vmatmul.mubr.msk.f32.vlgmr.msra.gmra.mxu0 %vm723_vm0, %v1624_v9  ;;  %2874 = vmatmul.mubr.msk.f32.vlgmr.msra.gmra.mxu1 %vm723_vm0, %v1630_v10 }
 0xc17   : > { %2867 = vmatprep.mubr.msk.f32.mxu0 %vm723_vm0, %v1625_v11 }
 0xc1a   : > { %2868 = vmatmul.mubr.msk.f32.gmra.mxu0 %vm723_vm0, %v1626_v12 }
 0xc1b   : > { %2870 = vmatprep.mubr.msk.f32.mxu0 %vm723_vm0, %v1627_v13 }
 0xc1e   : > { %2871 = vmatmul.mubr.msk.f32.gmra.mxu0 %vm723_vm0, %v1628_v14 }
 0xc1f   : > { %2896 = vmatprep.mubr.msk.bf16.mxu0 %vm3484_vm1, %v3483_v19 }
 0xcd6   : > { %v2866_v15 = vpop.f32.mrf.mxu0  ;;  %v2875_v21 = vpop.f32.mrf.mxu1 }
 0xcd7   : > { %v1737_v16 = vadd.f32 %v2866_v15, %v3826_v62  ;;  %v1767_v30 = vadd.f32 %v2875_v21, %v3826_v62 }
 0xcd8   : > { %v1731_v17 = vpop.f32.mrf.mxu0  ;;  %v1761_v27 = vpop.f32.mrf.mxu1 }
 0xcd9   : > { %v1732_v43 = vadd.f32 %v1731_v17, %v3826_v62  ;;  %v1773_v18 = vsel %vm982_vm13, %v1737_v16, -inf  ;;  %v1762_v31 = vadd.f32 %v1761_v27, %v3826_v62  ;;  %v1791_v34 = vsel %vm982_vm13, %v1767_v30, -inf }
 0xcda   : > { %1774 = vmax.xlane.f32.xlu0 %v1773_v18  ;;  %v2869_v47 = vpop.f32.mrf.mxu0 }
 0xcdb   : > { %v1747_v20 = vadd.f32 %v2869_v47, %v3826_v62  ;;  %v1770_v35 = vsel %vm982_vm13, %v1732_v43, -inf  ;;  %v1788_v37 = vsel %vm982_vm13, %v1762_v31, -inf }
 0xcdc   : > { %v1741_v22 = vpop.f32.mrf.mxu0  ;;  %1771 = vmax.xlane.f32.xlu1 %v1770_v35 }
 0xcdd   : > { %v1742_v23 = vadd.f32 %v1741_v22, %v3826_v62  ;;  %v1779_v26 = vsel %vm982_vm13, %v1747_v20, -inf }
 0xcde   : > { %v2872_v36 = vpop.f32.mrf.mxu0 }
 0xcdf   : > { %v1757_v24 = vadd.f32 %v2872_v36, %v3826_v62  ;;  %v1776_v25 = vsel %vm982_vm13, %v1742_v23, -inf }
 0xce0   : > { %v1751_v28 = vpop.f32.mrf.mxu0  ;;  %1777 = vmax.xlane.f32.xlu0 %v1776_v25  ;;  %1780 = vmax.xlane.f32.xlu1 %v1779_v26 }
 0xce1   : > { %v1752_v29 = vadd.f32 %v1751_v28, %v3826_v62  ;;  %v1785_v33 = vsel %vm982_vm13, %v1757_v24, -inf }
 0xce3   : > { %v1782_v32 = vsel %vm982_vm13, %v1752_v29, -inf }
 0xce4   : > { %1783 = vmax.xlane.f32.xlu0 %v1782_v32  ;;  %1786 = vmax.xlane.f32.xlu1 %v1785_v33 }
 0xce8   : > { %1792 = vmax.xlane.f32.xlu1 %v1791_v34  ;;  %1789 = vmax.xlane.f32.xlu0 %v1788_v37 }
 0xd63   : > { %v1775_v38 = vpop.xlane.xlu0 %1774 }
 0xd64   : > { %v1795_v39 = vsub.f32 %v1737_v16, %v1775_v38 }
 0xd65   : > { %v1772_v40 = vpop.xlane.xlu1 %1771 }
 0xd66   : > { %v1804_v41 = vmul.f32 1.442695, %v1795_v39  ;;  %v1794_v44 = vsub.f32 %v1732_v43, %v1772_v40 }
 0xd68   : > { %3135 = vpow2.f32 %v1804_v41  ;;  %v1802_v45 = vmul.f32 1.442695, %v1794_v44 }
 0xd69   : > { %v1778_v62 = vpop.xlane.xlu0 %1777  ;;  %v1781_v46 = vpop.xlane.xlu1 %1780 }
 0xd6a   : > { %3137 = vpow2.f32 %v1802_v45  ;;  %v1797_v50 = vsub.f32 %v1747_v20, %v1781_v46  ;;  %v1796_v52 = vsub.f32 %v1742_v23, %v1778_v62 }
 0xd6c   : > { %v1808_v61 = vmul.f32 1.442695, %v1797_v50  ;;  %v1806_v4 = vmul.f32 1.442695, %v1796_v52  ;;  %v3078_v50 = vld [vmem:[%s4157_s6 + $0x10] sm:$0xff]  }
 0xd6d   : > { %v1784_v48 = vpop.xlane.xlu0 %1783  ;;  %v1787_v49 = vpop.xlane.xlu1 %1786 }
 0xd6e   : > { %v1799_v63 = vsub.f32 %v1757_v24, %v1787_v49  ;;  %v1798_v6 = vsub.f32 %v1752_v29, %v1784_v48  ;;  %v3077_v49 = vld [vmem:[%s4157_s6 + $0x18] sm:$0xff]  }
 0xd6f   : > { %2893 = vmatpush3.bf16.msra.mxu0 %v3077_v49 }
 0xd70   : > { %v1812_v9 = vmul.f32 1.442695, %v1799_v63  ;;  %v1810_v11 = vmul.f32 1.442695, %v1798_v6  ;;  %2894 = vmatprep.subr.bf16.mxu0 %v3483_v19 }
 0xd71   : > { %v1793_v53 = vpop.xlane.xlu1 %1792  ;;  %v1790_v55 = vpop.xlane.xlu0 %1789 }
 0xd72   : > { %v1801_v56 = vsub.f32 %v1767_v30, %v1793_v53  ;;  %v1800_v60 = vsub.f32 %v1762_v31, %v1790_v55 }
 0xd73   : > { %2895 = vmatpush3.bf16.msra.mxu0 %v3078_v50 }
 0xd74   : > { %v1816_v1 = vmul.f32 1.442695, %v1801_v56  ;;  %v1814_v2 = vmul.f32 1.442695, %v1800_v60  ;;  %2908 = vmatprep.subr.bf16.mxu0 %v3483_v19 }
 0xd75   : > { %v3136_v3 = vpop.eup %3135 }
 0xd76   : > { %3139 = vpow2.f32 %v1816_v1  ;;  %v1821_v7 = vsel %vm982_vm13, %v3136_v3, 0.0 }
 0xd77   : > { %v3138_v8 = vpop.eup %3137  ;;  %3141 = vpow2.f32 %v1814_v2  ;;  %1822 = vadd.xlane.f32.xlu1 %v1821_v7 }
 0xd78   : > { %3143 = vpow2.f32 %v1808_v61  ;;  %v1818_v10 = vsel %vm982_vm13, %v3138_v8, 0.0 }
 0xd79   : > { %3145 = vpow2.f32 %v1806_v4  ;;  %1819 = vadd.xlane.f32.xlu0 %v1818_v10 }
 0xd7a   : > { %3147 = vpow2.f32 %v1812_v9 }
 0xd7b   : > { %3149 = vpow2.f32 %v1810_v11 }
 0xd83   : > { %v4004_v12 = vpop.eup %3139 }
 0xd84   : > { %v3142_v13 = vpop.eup %3141  ;;  %v1839_v14 = vsel %vm982_vm13, %v4004_v12, 0.0 }
 0xd85   : > { %v3144_v15 = vpop.eup %3143  ;;  %1840 = vadd.xlane.f32.xlu1 %v1839_v14  ;;  %v1836_v16 = vsel %vm982_vm13, %v3142_v13, 0.0 }
 0xd86   : > { %v3146_v17 = vpop.eup %3145  ;;  %1837 = vadd.xlane.f32.xlu0 %v1836_v16  ;;  %v1827_v43 = vsel %vm982_vm13, %v3144_v15, 0.0 }
 0xd87   : > { %v3148_v18 = vpop.eup %3147  ;;  %v1824_v47 = vsel %vm982_vm13, %v3146_v17, 0.0 }
 0xd88   : > { %v3150_v20 = vpop.eup %3149  ;;  %v1833_v35 = vsel %vm982_vm13, %v3148_v18, 0.0 }
 0xd89   : > { %1828 = vadd.xlane.f32.xlu1 %v1827_v43  ;;  %v1830_v21 = vsel %vm982_vm13, %v3150_v20, 0.0 }
 0xd8a   : > { %1825 = vadd.xlane.f32.xlu0 %v1824_v47 }
 0xd8d   : > { %1834 = vadd.xlane.f32.xlu1 %v1833_v35 }
 0xd8e   : > { %1831 = vadd.xlane.f32.xlu0 %v1830_v21 }
 0xd9e   : > { %1858 = vrot.lane.b32.xlu1 %v3943_v0, %s3487_s30 }
 0xda4   : > { %1860 = vrot.lane.b32.xlu0 %v3951_v5, %s3487_s30 }
 0xe00   : > { %v1823_v23 = vpop.xlane.xlu1 %1822 }
 0xe02   : > { %v1820_v22 = vpop.xlane.xlu0 %1819 }
 0xe03   : > { %3151 = vrcp.f32 %v1820_v22 }
 0xe04   : > { %3153 = vrcp.f32 %v1823_v23 }
 0xe0e   : > { %v1841_v36 = vpop.xlane.xlu1 %1840 }
 0xe0f   : > { %v1838_v24 = vpop.xlane.xlu0 %1837 }
 0xe10   : > { %v3152_v25 = vpop.eup %3151 }
 0xe11   : > { %v1850_v26 = vmul.f32 %v3152_v25, %v3138_v8  ;;  %v3154_v5 = vpop.eup %3153 }
 0xe12   : > { %v1829_v27 = vpop.xlane.xlu1 %1828  ;;  %v1851_v32 = vmul.f32 %v3154_v5, %v3136_v3  ;;  %v3079_v5 = vld [vmem:[#allocation14 + $0x18] sm:$0xff]  }
 0xe13   : > { %3155 = vrcp.f32 %v1829_v27  ;;  %v1826_v28 = vpop.xlane.xlu0 %1825  ;;  %2880 = vmatprep.mubr.msk.f32.mxu1 %vm982_vm13, %v1850_v26 }
 0xe14   : > { %3157 = vrcp.f32 %v1826_v28 }
 0xe15   : > { %3159 = vrcp.f32 %v1838_v24 }
 0xe16   : > { %v1835_v29 = vpop.xlane.xlu1 %1834 }
 0xe17   : > { %3161 = vrcp.f32 %v1835_v29  ;;  %v1832_v0 = vpop.xlane.xlu0 %1831 }
 0xe18   : > { %3163 = vrcp.f32 %v1832_v0 }
 0xe19   : > { %3165 = vrcp.f32 %v1841_v36 }
 0xe1a   : > { %v1859_v31 = vpop.permute.xlu1 %1858 }
 0xe1b   : > { %v1861_v30 = vpop.permute.xlu0 %1860 }
 0xe1c   : > { %2876 = vmatprep.subr.mxu1 %v1861_v30 }
 0xe1d   : > { %2877 = vmatpush3.msra.mxu1 %v1861_v30 }
 0xe1e   : > { %2878 = vmatprep.subr.mxu1 %v1859_v31 }
 0xe1f   : > { %2879 = vmatpush3.msra.mxu1 %v1859_v31 }
 0xe20   : > { %v3156_v33 = vpop.eup %3155  ;;  %2881 = vmatmul.mubr.msk.f32.vlgmr.msra.gmra.mxu1 %vm982_vm13, %v1851_v32  ;;  %2900 = vmatprep.subr.bf16.mxu1 %v3483_v19 }
 0xe21   : > { %v3158_v34 = vpop.eup %3157  ;;  %v1853_v37 = vmul.f32 %v3156_v33, %v3144_v15  ;;  %2901 = vmatpush3.bf16.msra.mxu1 %v3079_v5 }
 0xe22   : > { %v1852_v38 = vmul.f32 %v3158_v34, %v3146_v17  ;;  %v3160_v39 = vpop.eup %3159  ;;  %2902 = vmatprep.subr.bf16.mxu1 %v3483_v19 }
 0xe23   : > { %v1856_v46 = vmul.f32 %v3160_v39, %v3142_v13 }
 0xe24   : > { %v3162_v40 = vpop.eup %3161  ;;  %2883 = vmatprep.mubr.msk.f32.mxu1 %vm982_vm13, %v1852_v38 }
 0xe25   : > { %v3164_v41 = vpop.eup %3163  ;;  %2884 = vmatmul.mubr.msk.f32.gmra.mxu1 %vm982_vm13, %v1853_v37  ;;  %v1855_v44 = vmul.f32 %v3162_v40, %v3148_v18  ;;  %v2677_v40 = vld [vmem:[#allocation11 + $0x1] ss:$0 sm:$0xff] }
 0xe26   : > { %v1854_v45 = vmul.f32 %v3164_v41, %v3150_v20  ;;  %v3166_v62 = vpop.eup %3165 }
 0xe27   : > { %v1857_v48 = vmul.f32 %v3166_v62, %v4004_v12  ;;  %v2678_v62 = vld [vmem:[#allocation13 + $0x1] ss:$0 sm:$0xff] }
 0xe28   : > { %2886 = vmatprep.mubr.msk.f32.mxu1 %vm982_vm13, %v1854_v45 }
 0xe29   : > { %2887 = vmatmul.mubr.msk.f32.gmra.mxu1 %vm982_vm13, %v1855_v44 }
 0xe2a   : > { %2889 = vmatprep.mubr.msk.f32.mxu1 %vm982_vm13, %v1856_v46 }
 0xe2d   : > { %2890 = vmatmul.mubr.msk.f32.gmra.mxu1 %vm982_vm13, %v1857_v48 }
 0xe2e   : > { %2904 = vmatprep.mubr.msk.bf16.mxu1 %vm3484_vm1, %v3483_v19 }
 0xee0   : > { %v2882_v52 = vpop.f32.mrf.mxu1 }
 0xee1   : > { %v1994_v2 = vmul.f32 %v2882_v52, %v3776_v42  ;;  %v3081_v52 = vld [vmem:[%s4163_s12 + $0x38] sm:$0xff]  }
 0xee2   : > { %v1954_v53 = vpop.f32.mrf.mxu1 }
 0xee3   : > { %v1993_v3 = vmul.f32 %v3776_v42, %v1954_v53  ;;  %v2673_v42 = vld [vmem:[#allocation10 + $0x1] ss:$0 sm:$0xff] }
 0xee4   : > { %v3082_v53 = vld [vmem:[%s4163_s12 + $0x30] sm:$0xff]  }
 0xee5   : > { %v2885_v55 = vpop.f32.mrf.mxu1 }
 0xee6   : > { %v1998_v61 = vmul.f32 %v2885_v55, %v3793_v51  ;;  %v3083_v55 = vld [vmem:[%s4163_s12 + $0x28] sm:$0xff]  }
 0xee7   : > { %v1964_v56 = vpop.f32.mrf.mxu1 }
 0xee8   : > { %v1997_v63 = vmul.f32 %v3793_v51, %v1964_v56  ;;  %v2000_v8 = vadd.f32 %v1998_v61, %v1994_v2  ;;  %v3084_v56 = vld [vmem:[%s4163_s12 + $0x20] sm:$0xff]  }
 0xee9   : > { %v2888_v60 = vpop.f32.mrf.mxu1 }
 0xeea   : > { %v2002_v4 = vmul.f32 %v2888_v60, %v3803_v54  ;;  %v1999_v9 = vadd.f32 %v1997_v63, %v1993_v3  ;;  %v2680_v60 = vld [vmem:[%s4162_s11 + $0x1] ss:$0 sm:$0xff] }
 0xeeb   : > { %v1974_v1 = vpop.f32.mrf.mxu1 }
 0xeec   : > { %v2001_v6 = vmul.f32 %v3803_v54, %v1974_v1  ;;  %v2004_v12 = vadd.f32 %v2002_v4, %v2000_v8 }
 0xeed   : > { %v2891_v7 = vpop.f32.mrf.mxu1 }
 0xeee   : > { %v2006_v10 = vmul.f32 %v2891_v7, %v3812_v57  ;;  %v2003_v13 = vadd.f32 %v2001_v6, %v1999_v9 }
 0xeef   : > { %v1984_v11 = vpop.f32.mrf.mxu1 }
 0xef0   : > { %v2005_v14 = vmul.f32 %v3812_v57, %v1984_v11  ;;  %v2008_v51 = vadd.f32 %v2006_v10, %v2004_v12 }
 0xef2   : > { %v2007_v15 = vadd.f32 %v2005_v14, %v2003_v13 }
 0xef4   : > { %v2009_v16 = vpack.c.bf16 %v2008_v51, %v2007_v15 }
 0xef6   : > { %2897 = vmatmul.mubr.msk.bf16.vlgmr.msra.gmra.mxu0 %vm723_vm0, %v2009_v16 }
 0xef7   : > { %2916 = vmatprep.mubr.msk.bf16.mxu0 %vm3484_vm1, %v3483_v19  ;;  %2909 = vmatpush3.bf16.msra.mxu0 %v3081_v52 }
 0xef8   : > { %2910 = vmatprep.subr.bf16.mxu0 %v3483_v19 }
 0xefb   : > { %2911 = vmatpush3.bf16.msra.mxu0 %v3082_v53  ;;  %v2702_v53 = vld [vmem:[%s4166_s15 + $0x1] ss:$0 sm:$0xff] }
 0xefc   : > { %2912 = vmatprep.subr.bf16.mxu0 %v3483_v19 }
 0xeff   : > { %2913 = vmatpush3.bf16.msra.mxu0 %v3083_v55 }
 0xf00   : > { %2914 = vmatprep.subr.bf16.mxu0 %v3483_v19 }
 0xf03   : > { %2915 = vmatpush3.bf16.msra.mxu0 %v3084_v56 }
 0xfb6   : > { %v2072_v54 = vpop.f32.mrf.mxu0 }
 0xfb7   : > { %v2073_v17 = vadd.f32 %v2673_v42, %v2072_v54 }
 0xfb8   : > { %v2898_v43 = vpop.f32.mrf.mxu0 }
 0xfb9   : > { %v2079_v18 = vadd.f32 %v2073_v17, %v3936_v58 }
 0xfba   : > { %v2075_v47 = vpop.f32.mrf.mxu0 }
 0xfbb   : > { %v2076_v20 = vadd.f32 %v2673_v42, %v2075_v47  ;;  %v2085_v35 = vsel %vm723_vm0, %v2079_v18, 0.0 }
 0xfbc   : > { %2086 = vadd.xlane.f32.xlu1 %v2085_v35  ;;  %v2899_v57 = vpop.f32.mrf.mxu0  ;;  %v2693_v35 = vld [vmem:[%s4164_s13 + $0x1] ss:$0 sm:$0xff] }
 0xfbd   : > { %v2080_v21 = vadd.f32 %v2076_v20, %v3938_v59  ;;  %v3080_v59 = vld [vmem:[#allocation14 + $0x10] sm:$0xff]  }
 0xfbe   : > { %2903 = vmatpush3.bf16.msra.mxu1 %v3080_v59 }
 0xfbf   : > { %v2088_v22 = vsel %vm723_vm0, %v2080_v21, 0.0  ;;  %2920 = vmatprep.subr.bf16.mxu1 %v3483_v19 }
 0xfc0   : > { %2089 = vadd.xlane.f32.xlu0 %v2088_v22 }
0x1045   : > { %v2087_v23 = vpop.xlane.xlu1 %2086 }
0x1046   : > { %v2091_v36 = vmul.f32 0.03125, %v2087_v23 }
0x1048   : > { %v2093_v24 = vsub.f32 %v2079_v18, %v2091_v36 }
0x1049   : > { %v2090_v25 = vpop.xlane.xlu0 %2089 }
0x104a   : > { %v2092_v26 = vmul.f32 0.03125, %v2090_v25  ;;  %v2095_v27 = vmul.f32 %v2093_v24, %v2093_v24 }
0x104c   : > { %v2094_v28 = vsub.f32 %v2080_v21, %v2092_v26  ;;  %v2097_v58 = vsel %vm723_vm0, %v2095_v27, 0.0 }
0x104d   : > { %2098 = vadd.xlane.f32.xlu0 %v2097_v58 }
0x104e   : > { %v2096_v29 = vmul.f32 %v2094_v28, %v2094_v28 }
0x1050   : > { %v2100_v0 = vsel %vm723_vm0, %v2096_v29, 0.0 }
0x1051   : > { %2101 = vadd.xlane.f32.xlu1 %v2100_v0 }
0x10d6   : > { %v2099_v30 = vpop.xlane.xlu0 %2098 }
0x10d7   : > { %v2103_v31 = vmul.f32 0.03125, %v2099_v30 }
0x10d9   : > { %v2105_v32 = vadd.f32 1e-12, %v2103_v31 }
0x10da   : > { %v2102_v33 = vpop.xlane.xlu1 %2101 }
0x10db   : > { %3167 = vrsqrt.f32 %v2105_v32  ;;  %v2104_v34 = vmul.f32 0.03125, %v2102_v33 }
0x10dd   : > { %v2106_v37 = vadd.f32 1e-12, %v2104_v34 }
0x10df   : > { %3169 = vrsqrt.f32 %v2106_v37  ;;  %v3085_v37 = vld [vmem:[%s4167_s16 + $0x8] sm:$0xff]  }
0x10e8   : > { %v3168_v38 = vpop.eup %3167 }
0x10e9   : > { %v2109_v39 = vmul.f32 %v3168_v38, %v2093_v24  ;;  %v3086_v38 = vld [vmem:[%s4167_s16] sm:$0xff]  }
0x10eb   : > { %v2117_v44 = vmul.f32 %v2677_v40, %v2109_v39 }
0x10ec   : > { %v3170_v41 = vpop.eup %3169 }
0x10ed   : > { %v2110_v45 = vmul.f32 %v3170_v41, %v2094_v28  ;;  %v2125_v48 = vadd.f32 %v2678_v62, %v2117_v44 }
0x10ef   : > { %v2118_v46 = vmul.f32 %v2677_v40, %v2110_v45 }
0x10f1   : > { %v2126_v49 = vadd.f32 %v2678_v62, %v2118_v46 }
0x10f3   : > { %v2127_v50 = vpack.c.bf16 %v2126_v49, %v2125_v48 }
0x10f5   : > { %2905 = vmatmul.mubr.msk.bf16.vlgmr.msra.gmra.mxu1 %vm723_vm0, %v2127_v50 }
0x10f6   : > { %2924 = vmatprep.mubr.msk.bf16.mxu1 %vm3484_vm1, %v3483_v19  ;;  %2921 = vmatpush3.bf16.msra.mxu1 %v3085_v37 }
0x10f7   : > { %2922 = vmatprep.subr.bf16.mxu1 %v3483_v19 }
0x10fa   : > { %2923 = vmatpush3.bf16.msra.mxu1 %v3086_v38 }
0x11b5   : > { %v2190_v61 = vpop.f32.mrf.mxu1 }
0x11b6   : > { %v2191_v63 = vadd.f32 %v2680_v60, %v2190_v61 }
0x11b7   : > { %v2906_v1 = vpop.f32.mrf.mxu1 }
0x11b8   : > { %v2199_v2 = vmul.f32 0.044715, %v2191_v63  ;;  %v2197_v54 = vmul.f32 0.5, %v2191_v63 }
0x11b9   : > { %v2193_v3 = vpop.f32.mrf.mxu1 }
0x11ba   : > { %v2201_v4 = vmul.f32 %v2199_v2, %v2191_v63  ;;  %v2194_v6 = vadd.f32 %v2680_v60, %v2193_v3 }
0x11bb   : > { %v2907_v7 = vpop.f32.mrf.mxu1 }
0x11bc   : > { %v2203_v8 = vmul.f32 %v2201_v4, %v2191_v63  ;;  %v2200_v9 = vmul.f32 0.044715, %v2194_v6  ;;  %v2198_v17 = vmul.f32 0.5, %v2194_v6 }
0x11be   : > { %v2205_v10 = vadd.f32 %v2203_v8, %v2191_v63  ;;  %v2202_v11 = vmul.f32 %v2200_v9, %v2194_v6  ;;  %v2703_v63 = vld [vmem:[%s4168_s17] ss:$0 sm:$0xff] }
0x11c0   : > { %v2207_v12 = vmul.f32 0.7978846, %v2205_v10  ;;  %v2204_v13 = vmul.f32 %v2202_v11, %v2194_v6 }
0x11c2   : > { %3171 = vtanh.f32 %v2207_v12  ;;  %v2206_v14 = vadd.f32 %v2204_v13, %v2194_v6 }
0x11c4   : > { %v2208_v51 = vmul.f32 0.7978846, %v2206_v14 }
0x11c6   : > { %3173 = vtanh.f32 %v2208_v51 }
0x11cf   : > { %v3172_v15 = vpop.eup %3171 }
0x11d0   : > { %v2211_v16 = vadd.f32 1.0, %v3172_v15 }
0x11d2   : > { %v2213_v18 = vmul.f32 %v2211_v16, %v2197_v54 }
0x11d3   : > { %v3174_v42 = vpop.eup %3173 }
0x11d4   : > { %v2212_v43 = vadd.f32 1.0, %v3174_v42 }
0x11d6   : > { %v2214_v47 = vmul.f32 %v2212_v43, %v2198_v17 }
0x11d8   : > { %v2215_v20 = vpack.c.bf16 %v2214_v47, %v2213_v18 }
0x11da   : > { %2917 = vmatmul.mubr.msk.bf16.vlgmr.msra.gmra.mxu0 %vm1462_vm14, %v2215_v20 }
0x129a   : > { %v2294_v57 = vpop.f32.mrf.mxu0 }
0x129b   : > { %v2295_v21 = vadd.f32 %v2693_v35, %v2294_v57 }
0x129c   : > { %v2918_v22 = vpop.f32.mrf.mxu0 }
0x129d   : > { %v2301_v23 = vadd.f32 %v2295_v21, %v2125_v48 }
0x129e   : > { %v2297_v36 = vpop.f32.mrf.mxu0 }
0x129f   : > { %v2298_v24 = vadd.f32 %v2693_v35, %v2297_v36  ;;  %v2307_v25 = vsel %vm723_vm0, %v2301_v23, 0.0 }
0x12a0   : > { %2308 = vadd.xlane.f32.xlu0 %v2307_v25  ;;  %v2919_v26 = vpop.f32.mrf.mxu0 }
0x12a1   : > { %v2302_v27 = vadd.f32 %v2298_v24, %v2126_v49  ;;  %v2701_v49 = vld [vmem:[%s4165_s14 + $0x1] ss:$0 sm:$0xff] }
0x12a3   : > { %v2310_v28 = vsel %vm723_vm0, %v2302_v27, 0.0 }
0x12a4   : > { %2311 = vadd.xlane.f32.xlu1 %v2310_v28 }
0x1329   : > { %v2309_v58 = vpop.xlane.xlu0 %2308 }
0x132a   : > { %v2313_v29 = vmul.f32 0.03125, %v2309_v58 }
0x132c   : > { %v2315_v0 = vsub.f32 %v2301_v23, %v2313_v29 }
0x132d   : > { %v2312_v5 = vpop.xlane.xlu1 %2311 }
0x132e   : > { %v2314_v59 = vmul.f32 0.03125, %v2312_v5  ;;  %v2317_v30 = vmul.f32 %v2315_v0, %v2315_v0 }
0x1330   : > { %v2316_v31 = vsub.f32 %v2302_v27, %v2314_v59  ;;  %v2319_v32 = vsel %vm723_vm0, %v2317_v30, 0.0 }
0x1331   : > { %2320 = vadd.xlane.f32.xlu0 %v2319_v32 }
0x1332   : > { %v2318_v33 = vmul.f32 %v2316_v31, %v2316_v31 }
0x1334   : > { %v2322_v34 = vsel %vm723_vm0, %v2318_v33, 0.0 }
0x1335   : > { %2323 = vadd.xlane.f32.xlu1 %v2322_v34 }
0x13ba   : > { %v2321_v39 = vpop.xlane.xlu0 %2320 }
0x13bb   : > { %v2325_v40 = vmul.f32 0.03125, %v2321_v39 }
0x13bd   : > { %v2327_v41 = vadd.f32 1e-12, %v2325_v40 }
0x13be   : > { %v2324_v44 = vpop.xlane.xlu1 %2323 }
0x13bf   : > { %3175 = vrsqrt.f32 %v2327_v41  ;;  %v2326_v45 = vmul.f32 0.03125, %v2324_v44 }
0x13c1   : > { %v2328_v62 = vadd.f32 1e-12, %v2326_v45 }
0x13c3   : > { %3177 = vrsqrt.f32 %v2328_v62 }
0x13cc   : > { %v3176_v46 = vpop.eup %3175 }
0x13cd   : > { %v2331_v48 = vmul.f32 %v3176_v46, %v2315_v0 }
0x13cf   : > { %v2339_v19 = vmul.f32 %v2701_v49, %v2331_v48 }
0x13d0   : > { %v3178_v50 = vpop.eup %3177 }
0x13d1   : > { %v2332_v52 = vmul.f32 %v3178_v50, %v2316_v31  ;;  %v2347_v56 = vadd.f32 %v2702_v53, %v2339_v19 }
0x13d3   : > { %v2340_v55 = vmul.f32 %v2701_v49, %v2332_v52 }
0x13d5   : > { %v2348_v60 = vadd.f32 %v2702_v53, %v2340_v55 }
0x13d7   : > { %v2349_v61 = vpack.c.bf16 %v2348_v60, %v2347_v56 }
0x13d9   : > { %2925 = vmatmul.mubr.msk.bf16.vlgmr.msra.gmra.mxu1 %vm723_vm0, %v2349_v61 }
0x1499   : > { %v2410_v1 = vpop.f32.mrf.mxu1 }
0x149a   : > { %v2411_v2 = vadd.f32 %v2703_v63, %v2410_v1 }
0x149b   : > { %v2926_v3 = vpop.f32.mrf.mxu1 }
0x149c   : > { %2417 = vst [vmem:[%s682_s26] sm:$0xff] %v2411_v2 }
0x149d   : > { %v2413_v4 = vpop.f32.mrf.mxu1 }
0x149e   : > { %v2414_v6 = vadd.f32 %v2703_v63, %v2413_v4 }
0x149f   : > { %v2927_v7 = vpop.f32.mrf.mxu1 }
0x14a0   : > { %2418 = vst [vmem:[%s682_s26 + $0x8] sm:$0xff] %v2414_v6 }
0x14a1   : > { %3400 = shalt.err (!%p3397_p9)
}
0x14a2   : > { %s3401_s21 = scalar_lea.hbm %s4109_s29, 256  ;;  %s3405_s26 = scalar_lea.hbm %s4220_s25, 512 }
0x14a3   : > { %p3402_p12 = scmp.ne.s32.totalorder %s4109_s29, %s3401_s21  ;;  %p3406_p0 = scmp.lt.s32.totalorder %s4109_s29, %s4220_s25 }
0x14a4   : > { %p3407_p1 = scmp.lt.s32.totalorder %s3405_s26, %s3401_s21 }
0x14a5   : > { %p3403_p8 = pnand %p3402_p12, %p4221_p5 }
0x14a6   : > { %p3408_p3 = por %p3407_p1, %p3406_p0 }
0x14a7   : > { %p3404_p11 = pneg %p3403_p8 }
0x14a9   : > { %p3409_p2 = pnand %p3408_p3, %p3404_p11 }
0x14ab   : > { %3412 = shalt.err (!%p3409_p2)
}
0x14ac   : > { %s3489_s8 = smov 128   ;;  %s3490_s27 = smov 8  }
0x14ad   : > { %2964 = dma.vmem_to_hbm [thread:$0]  (%p4221_p5), %s4104_s5, 256, %s4109_s29, %s4111_s20, %s3489_s8, %s3489_s8, %s3490_s27  }
0x14ae PF: > { %s4222_s1 = sld [smem:[#allocation25_spill]] }
0x14af   : > { %s4223_s0 = sld [smem:[#allocation23_spill]] }
0x14b0   : > { %s4224_s24 = sld [smem:[#allocation28_spill]] }
0x14b4   : > { %p3011_p6 = scmp.ge.s32.totalorder %s4222_s1, 2 }
0x14b5   : > { %s2448_s18 = sand.u32 1, %s4223_s0  }
0x14b6   : > { %p4225_p10 = scmp.ne.s32.totalorder %s4224_s24, 0  ;;  %s2449_s21 = scalar_lea.sflag [#allocation4], %s2448_s18 }
0x14b8   : > { %p2992_p13 = pnand %p3011_p6, %p4225_p10 }
0x14ba   : > { %p2993_p4 = pneg %p2992_p13 }
0x14bc   : > { %3450 = dma.done.wait (%p2993_p4), %s2449_s21, 256  }
0x14bd   : > { %3452 = vsyncadd (%p2993_p4), %s2449_s21, 4294967040  ;;  %s4226_s30 = sld [smem:[#allocation26_spill]]  ;;  %s4229_s27 = smov %s3459_s28 }
0x14be   : > { %s4227_s19 = sld [smem:[#allocation24_spill]] }
0x14bf   : > { %s4228_s29 = sld [smem:[#allocation27_spill]] }
0x14c3   : > { %p33_p7 = scmp.ge.s32.totalorder %s4226_s30, 4  }
0x14c4   : > { %s4230_s28 = smov %s4227_s19 }
0x14c5   :  { %35 = sbr.rel (!%p33_p7) target bundleno = 15 (0xf), region = 172 }
0x14ca   :  { %2454 = vsyncpa [#allocation3], 1 }
0x14cb   :  { %2456 = vsyncpa [#allocation3 + $0x1], 1 }
0x14cc   :  { %2457 = vsyncpa [#allocation6], 1 }
0x14cd   :  { %2458 = vsyncpa [#allocation9], 1 }
0x14ce   :  { %2459 = vsyncpa [#allocation12], 1 }
0x14cf   :  { %2460 = vsyncpa [#allocation15], 1 }
0x14d0   :  { %2461 = vsyncpa [#allocation4], 1 }
0x14d1   :  { %2463 = vsyncpa [#allocation4 + $0x1], 1 }

</bundles_post_ra>
